<compile_context>
chip_gen: v7x
topology: tpu7x:2x2x1
jax: 0.10.0
libtpu: 0.0.40
codegen_flags: <defaults>
</compile_context>

<pallas_src>
import jax
import jax.numpy as jnp
from jax import lax
from jax.experimental import pallas as pl
from jax.experimental.pallas import tpu as pltpu

# Model hyper-params (from the PyTorch module)
DW = 300      # embedding dim
DH = 50       # hidden dim
NCLS = 4      # output classes
VOCAB = 100   # synthetic len(words) + 1

# TPU-friendly padded layout
DH_PAD = 128      # lane-aligned hidden width (tanh(0)=0 keeps pad cols zero)
NCLS_PAD = 128    # lane-dense classifier width (unmasked vst)
B_TILE = 8        # sublane-aligned batch tile
NEG_INF = -1e30   # padded-class bias -> exp underflows to exactly 0 in softmax


def rnn_kernel(xw_ref, whh_ref, wlin_ref, blin_ref, out_ref, h_scratch):
    """Recurrent core + last-step classifier + softmax.

    xw_ref   : (T_BLK, B_TILE, DH_PAD)  precomputed x@W_ih^T + (b_ih+b_hh)
    whh_ref  : (DH_PAD, DH_PAD)         hidden->hidden weight (transposed, 0-padded)
    wlin_ref : (DH_PAD, NCLS_PAD)       classifier weight (transposed, 0-padded)
    blin_ref : (1, NCLS_PAD)            classifier bias (-inf in padded classes)
    out_ref  : (B_TILE, NCLS_PAD)       softmax probabilities (padded)
    h_scratch: (B_TILE, DH_PAD)         hidden state carried across time blocks
    """
    t_blk = pl.program_id(1)

    # h0 = zeros (PyTorch default when h=None)
    @pl.when(t_blk == 0)
    def _():
        h_scratch[...] = jnp.zeros_like(h_scratch)

    # Input projection already hoisted out of the loop: each step is only the
    # tiny (B_TILE, DH_PAD) @ (DH_PAD, DH_PAD) matmul + tanh, with h carried
    # as a loop value (no per-step VMEM round-trip). Unrolled for scheduling.
    def step(t, h):
        pre = xw_ref[t] + jnp.dot(h, whh_ref[...],
                                  preferred_element_type=jnp.float32)
        return jnp.tanh(pre)

    h = lax.fori_loop(0, xw_ref.shape[0], step, h_scratch[...], unroll=True)
    h_scratch[...] = h  # persist across time blocks (grid axis 1)

    # y = y[:, -1, :] -> linear -> softmax, only once at the final time block.
    @pl.when(t_blk == pl.num_programs(1) - 1)
    def _():
        logits = (jnp.dot(h, wlin_ref[...],
                          preferred_element_type=jnp.float32)
                  + blin_ref[...])                       # (B_TILE, NCLS_PAD)
        m = jnp.max(logits, axis=-1, keepdims=True)
        e = jnp.exp(logits - m)                          # padded classes -> 0
        out_ref[...] = e / jnp.sum(e, axis=-1, keepdims=True)


def _largest_divisor_leq(n, cap):
    for d in range(min(n, cap), 0, -1):
        if n % d == 0:
            return d
    return 1


@jax.jit
def rnn_forward(tokens, params):
    """tokens: (B, T) int32 indices. Returns (B, NCLS) float32 softmax probs."""
    B, T = tokens.shape

    # --- glue in plain JAX: project the embedding table once and gather the
    # already-projected DH-wide rows in time-major order (no (B,T,300) slab,
    # no transpose of the big activation, 6x less HBM/VMEM traffic).
    bias = params["b_ih"] + params["b_hh"]                       # (DH,)
    proj = params["emb"] @ params["w_ih"].T + bias               # (VOCAB, DH)
    proj = jnp.pad(proj, ((0, 0), (0, DH_PAD - DH))).astype(jnp.float32)

    b_pad = pl.cdiv(B, B_TILE) * B_TILE
    tok = jnp.pad(tokens, ((0, b_pad - B), (0, 0)))              # pad batch
    xw_tm = proj[tok.T]                                          # (T, b_pad, DH_PAD)

    # Zero-padded weights: padded hidden columns stay exactly 0 through
    # tanh(0)=0 and contribute nothing to the classifier.
    whh = jnp.pad(params["w_hh"].T, ((0, DH_PAD - DH), (0, DH_PAD - DH)))
    wlin = jnp.pad(params["w_lin"].T, ((0, DH_PAD - DH), (0, NCLS_PAD - NCLS)))
    blin = jnp.pad(params["b_lin"], (0, NCLS_PAD - NCLS),
                   constant_values=NEG_INF).reshape(1, NCLS_PAD)

    t_blk = _largest_divisor_leq(T, 32)        # timesteps per grid step
    grid = (b_pad // B_TILE, T // t_blk)       # (batch tiles, time blocks)

    out = pl.pallas_call(
        rnn_kernel,
        out_shape=jax.ShapeDtypeStruct((b_pad, NCLS_PAD), jnp.float32),
        grid=grid,
        in_specs=[
            pl.BlockSpec((t_blk, B_TILE, DH_PAD), lambda b, t: (t, b, 0)),
            pl.BlockSpec((DH_PAD, DH_PAD), lambda b, t: (0, 0)),
            pl.BlockSpec((DH_PAD, NCLS_PAD), lambda b, t: (0, 0)),
            pl.BlockSpec((1, NCLS_PAD), lambda b, t: (0, 0)),
        ],
        out_specs=pl.BlockSpec((B_TILE, NCLS_PAD), lambda b, t: (b, 0)),
        scratch_shapes=[pltpu.VMEM((B_TILE, DH_PAD), jnp.float32)],
        compiler_params=pltpu.CompilerParams(
            dimension_semantics=("parallel", "arbitrary")),
    )(xw_tm, whh, wlin, blin)

    return out[:B, :NCLS]


def init_params(key):
    ks = jax.random.split(key, 7)
    # Embedding: N(0, 1) like torch.nn.Embedding default
    emb = jax.random.normal(ks[0], (VOCAB, DW), jnp.float32)
    # RNN / Linear params: U(-1/sqrt(dh), 1/sqrt(dh)) like PyTorch defaults
    s = 1.0 / jnp.sqrt(DH)
    return {
        "emb": emb,
        "w_ih": jax.random.uniform(ks[1], (DH, DW), jnp.float32, -s, s),
        "w_hh": jax.random.uniform(ks[2], (DH, DH), jnp.float32, -s, s),
        "b_ih": jax.random.uniform(ks[3], (DH,), jnp.float32, -s, s),
        "b_hh": jax.random.uniform(ks[4], (DH,), jnp.float32, -s, s),
        "w_lin": jax.random.uniform(ks[5], (NCLS, DH), jnp.float32, -s, s),
        "b_lin": jax.random.uniform(ks[6], (NCLS,), jnp.float32, -s, s),
    }


def rnn_reference(tokens, params):
    """Pure-JAX reference matching the PyTorch forward (for correctness)."""
    x = params["emb"][tokens]                                   # (B, T, DW)
    h = jnp.zeros((tokens.shape[0], DH), jnp.float32)
    for t in range(tokens.shape[1]):
        h = jnp.tanh(x[:, t] @ params["w_ih"].T + params["b_ih"]
                     + h @ params["w_hh"].T + params["b_hh"])
    logits = h @ params["w_lin"].T + params["b_lin"]
    return jax.nn.softmax(logits, axis=-1)


if __name__ == "__main__":
    # Keep plain-JAX matmuls (projection table + reference) at f32 precision so
    # the correctness comparison against the in-kernel f32 dots is meaningful.
    jax.config.update("jax_default_matmul_precision", "float32")

    key = jax.random.PRNGKey(0)
    pkey, xkey = jax.random.split(key)
    params = init_params(pkey)

    B, T = 2, 8
    tokens = jax.random.randint(xkey, (B, T), 0, VOCAB, dtype=jnp.int32)

    probs = rnn_forward(tokens, params)
    jax.block_until_ready(probs)

    # sanity: shape, softmax rows sum to ~1, and match the pure-JAX reference
    assert probs.shape == (B, NCLS)
    assert bool(jnp.all(jnp.abs(jnp.sum(probs, axis=-1) - 1.0) < 1e-5))
    ref = rnn_reference(tokens, params)
    assert bool(jnp.all(jnp.abs(probs - ref) < 1e-4)), "mismatch vs reference"
    print("KERNEL_OK")
</pallas_src>

<mosaic_0001>
module attributes {stable_mosaic.version = 11 : i64} {
  func.func @rnn_kernel(%arg0: i32, %arg1: i32, %arg2: memref<8x8x128xf32, #tpu.memory_space<vmem>>, %arg3: memref<128x128xf32, #tpu.memory_space<vmem>>, %arg4: memref<128x128xf32, #tpu.memory_space<vmem>>, %arg5: memref<1x128xf32, #tpu.memory_space<vmem>>, %arg6: memref<8x128xf32, #tpu.memory_space<vmem>>, %arg7: memref<8x128xf32, #tpu.memory_space<vmem>>) attributes {dimension_semantics = [#tpu.dimension_semantics<parallel>, #tpu.dimension_semantics<arbitrary>], iteration_bounds = array<i64: 1, 1>, scalar_prefetch = 0 : i64, scratch_operands = 1 : i64, tpu.core_type = #tpu.core_type<tc>, window_params = [{transform_indices = @transform_0, window_bounds = array<i64: 8, 8, 128>}, {pipeline_mode = #tpu.pipeline_mode<synchronous>, transform_indices = @transform_1, window_bounds = array<i64: 128, 128>}, {pipeline_mode = #tpu.pipeline_mode<synchronous>, transform_indices = @transform_2, window_bounds = array<i64: 128, 128>}, {pipeline_mode = #tpu.pipeline_mode<synchronous>, transform_indices = @transform_3, window_bounds = array<i64: 1, 128>}, {transform_indices = @transform_4, window_bounds = array<i64: 8, 128>}]} {
    %c0_i32 = arith.constant 0 : i32
    %0 = arith.cmpi eq, %arg1, %c0_i32 : i32
    %1 = arith.extui %0 : i1 to i32
    %c0_i32_0 = arith.constant 0 : i32
    %2 = arith.cmpi ne, %1, %c0_i32_0 : i32
    scf.if %2 {
      %cst_46 = arith.constant 0.000000e+00 : f32
      %64 = vector.broadcast %cst_46 : f32 to vector<8x128xf32>
      %c0_47 = arith.constant 0 : index
      %c0_48 = arith.constant 0 : index
      %65 = vector.load %arg7[%c0_47, %c0_48] : memref<8x128xf32, #tpu.memory_space<vmem>>, vector<8x128xf32>
      tpu.vector_store %arg7[%c0_47, %c0_48], %64 {strides = array<i32>} : memref<8x128xf32, #tpu.memory_space<vmem>>, vector<8x128xf32>,
    } else {
    }
    %c0 = arith.constant 0 : index
    %c0_1 = arith.constant 0 : index
    %3 = vector.load %arg7[%c0, %c0_1] : memref<8x128xf32, #tpu.memory_space<vmem>>, vector<8x128xf32>
    %c0_i32_2 = arith.constant 0 : i32
    %4 = arith.index_cast %c0_i32_2 : i32 to index
    %c0_3 = arith.constant 0 : index
    %c0_4 = arith.constant 0 : index
    %5 = vector.load %arg2[%4, %c0_3, %c0_4] : memref<8x8x128xf32, #tpu.memory_space<vmem>>, vector<1x8x128xf32>
    %6 = vector.shape_cast %5 : vector<1x8x128xf32> to vector<8x128xf32>
    %c0_5 = arith.constant 0 : index
    %c0_6 = arith.constant 0 : index
    %7 = vector.load %arg3[%c0_5, %c0_6] : memref<128x128xf32, #tpu.memory_space<vmem>>, vector<128x128xf32>
    %cst = arith.constant dense<0.000000e+00> : vector<8x128xf32>
    %8 = tpu.matmul %3, %7, %cst {dimension_numbers = #tpu.dot_dimension_numbers<[1], [0], [0], [1], [0, 0, 1, 1], [], []>, precision = #tpu.contract_precision<fp32>} : vector<8x128xf32>, vector<128x128xf32>, vector<8x128xf32> -> vector<8x128xf32>
    %9 = arith.addf %6, %8 : vector<8x128xf32>
    %10 = math.tanh %9 : vector<8x128xf32>
    %c1_i32 = arith.constant 1 : i32
    %11 = arith.index_cast %c1_i32 : i32 to index
    %c0_7 = arith.constant 0 : index
    %c0_8 = arith.constant 0 : index
    %12 = vector.load %arg2[%11, %c0_7, %c0_8] : memref<8x8x128xf32, #tpu.memory_space<vmem>>, vector<1x8x128xf32>
    %13 = vector.shape_cast %12 : vector<1x8x128xf32> to vector<8x128xf32>
    %c0_9 = arith.constant 0 : index
    %c0_10 = arith.constant 0 : index
    %14 = vector.load %arg3[%c0_9, %c0_10] : memref<128x128xf32, #tpu.memory_space<vmem>>, vector<128x128xf32>
    %cst_11 = arith.constant dense<0.000000e+00> : vector<8x128xf32>
    %15 = tpu.matmul %10, %14, %cst_11 {dimension_numbers = #tpu.dot_dimension_numbers<[1], [0], [0], [1], [0, 0, 1, 1], [], []>, precision = #tpu.contract_precision<fp32>} : vector<8x128xf32>, vector<128x128xf32>, vector<8x128xf32> -> vector<8x128xf32>
    %16 = arith.addf %13, %15 : vector<8x128xf32>
    %17 = math.tanh %16 : vector<8x128xf32>
    %c2_i32 = arith.constant 2 : i32
    %18 = arith.index_cast %c2_i32 : i32 to index
    %c0_12 = arith.constant 0 : index
    %c0_13 = arith.constant 0 : index
    %19 = vector.load %arg2[%18, %c0_12, %c0_13] : memref<8x8x128xf32, #tpu.memory_space<vmem>>, vector<1x8x128xf32>
    %20 = vector.shape_cast %19 : vector<1x8x128xf32> to vector<8x128xf32>
    %c0_14 = arith.constant 0 : index
    %c0_15 = arith.constant 0 : index
    %21 = vector.load %arg3[%c0_14, %c0_15] : memref<128x128xf32, #tpu.memory_space<vmem>>, vector<128x128xf32>
    %cst_16 = arith.constant dense<0.000000e+00> : vector<8x128xf32>
    %22 = tpu.matmul %17, %21, %cst_16 {dimension_numbers = #tpu.dot_dimension_numbers<[1], [0], [0], [1], [0, 0, 1, 1], [], []>, precision = #tpu.contract_precision<fp32>} : vector<8x128xf32>, vector<128x128xf32>, vector<8x128xf32> -> vector<8x128xf32>
    %23 = arith.addf %20, %22 : vector<8x128xf32>
    %24 = math.tanh %23 : vector<8x128xf32>
    %c3_i32 = arith.constant 3 : i32
    %25 = arith.index_cast %c3_i32 : i32 to index
    %c0_17 = arith.constant 0 : index
    %c0_18 = arith.constant 0 : index
    %26 = vector.load %arg2[%25, %c0_17, %c0_18] : memref<8x8x128xf32, #tpu.memory_space<vmem>>, vector<1x8x128xf32>
    %27 = vector.shape_cast %26 : vector<1x8x128xf32> to vector<8x128xf32>
    %c0_19 = arith.constant 0 : index
    %c0_20 = arith.constant 0 : index
    %28 = vector.load %arg3[%c0_19, %c0_20] : memref<128x128xf32, #tpu.memory_space<vmem>>, vector<128x128xf32>
    %cst_21 = arith.constant dense<0.000000e+00> : vector<8x128xf32>
    %29 = tpu.matmul %24, %28, %cst_21 {dimension_numbers = #tpu.dot_dimension_numbers<[1], [0], [0], [1], [0, 0, 1, 1], [], []>, precision = #tpu.contract_precision<fp32>} : vector<8x128xf32>, vector<128x128xf32>, vector<8x128xf32> -> vector<8x128xf32>
    %30 = arith.addf %27, %29 : vector<8x128xf32>
    %31 = math.tanh %30 : vector<8x128xf32>
    %c4_i32 = arith.constant 4 : i32
    %32 = arith.index_cast %c4_i32 : i32 to index
    %c0_22 = arith.constant 0 : index
    %c0_23 = arith.constant 0 : index
    %33 = vector.load %arg2[%32, %c0_22, %c0_23] : memref<8x8x128xf32, #tpu.memory_space<vmem>>, vector<1x8x128xf32>
    %34 = vector.shape_cast %33 : vector<1x8x128xf32> to vector<8x128xf32>
    %c0_24 = arith.constant 0 : index
    %c0_25 = arith.constant 0 : index
    %35 = vector.load %arg3[%c0_24, %c0_25] : memref<128x128xf32, #tpu.memory_space<vmem>>, vector<128x128xf32>
    %cst_26 = arith.constant dense<0.000000e+00> : vector<8x128xf32>
    %36 = tpu.matmul %31, %35, %cst_26 {dimension_numbers = #tpu.dot_dimension_numbers<[1], [0], [0], [1], [0, 0, 1, 1], [], []>, precision = #tpu.contract_precision<fp32>} : vector<8x128xf32>, vector<128x128xf32>, vector<8x128xf32> -> vector<8x128xf32>
    %37 = arith.addf %34, %36 : vector<8x128xf32>
    %38 = math.tanh %37 : vector<8x128xf32>
    %c5_i32 = arith.constant 5 : i32
    %39 = arith.index_cast %c5_i32 : i32 to index
    %c0_27 = arith.constant 0 : index
    %c0_28 = arith.constant 0 : index
    %40 = vector.load %arg2[%39, %c0_27, %c0_28] : memref<8x8x128xf32, #tpu.memory_space<vmem>>, vector<1x8x128xf32>
    %41 = vector.shape_cast %40 : vector<1x8x128xf32> to vector<8x128xf32>
    %c0_29 = arith.constant 0 : index
    %c0_30 = arith.constant 0 : index
    %42 = vector.load %arg3[%c0_29, %c0_30] : memref<128x128xf32, #tpu.memory_space<vmem>>, vector<128x128xf32>
    %cst_31 = arith.constant dense<0.000000e+00> : vector<8x128xf32>
    %43 = tpu.matmul %38, %42, %cst_31 {dimension_numbers = #tpu.dot_dimension_numbers<[1], [0], [0], [1], [0, 0, 1, 1], [], []>, precision = #tpu.contract_precision<fp32>} : vector<8x128xf32>, vector<128x128xf32>, vector<8x128xf32> -> vector<8x128xf32>
    %44 = arith.addf %41, %43 : vector<8x128xf32>
    %45 = math.tanh %44 : vector<8x128xf32>
    %c6_i32 = arith.constant 6 : i32
    %46 = arith.index_cast %c6_i32 : i32 to index
    %c0_32 = arith.constant 0 : index
    %c0_33 = arith.constant 0 : index
    %47 = vector.load %arg2[%46, %c0_32, %c0_33] : memref<8x8x128xf32, #tpu.memory_space<vmem>>, vector<1x8x128xf32>
    %48 = vector.shape_cast %47 : vector<1x8x128xf32> to vector<8x128xf32>
    %c0_34 = arith.constant 0 : index
    %c0_35 = arith.constant 0 : index
    %49 = vector.load %arg3[%c0_34, %c0_35] : memref<128x128xf32, #tpu.memory_space<vmem>>, vector<128x128xf32>
    %cst_36 = arith.constant dense<0.000000e+00> : vector<8x128xf32>
    %50 = tpu.matmul %45, %49, %cst_36 {dimension_numbers = #tpu.dot_dimension_numbers<[1], [0], [0], [1], [0, 0, 1, 1], [], []>, precision = #tpu.contract_precision<fp32>} : vector<8x128xf32>, vector<128x128xf32>, vector<8x128xf32> -> vector<8x128xf32>
    %51 = arith.addf %48, %50 : vector<8x128xf32>
    %52 = math.tanh %51 : vector<8x128xf32>
    %c7_i32 = arith.constant 7 : i32
    %53 = arith.index_cast %c7_i32 : i32 to index
    %c0_37 = arith.constant 0 : index
    %c0_38 = arith.constant 0 : index
    %54 = vector.load %arg2[%53, %c0_37, %c0_38] : memref<8x8x128xf32, #tpu.memory_space<vmem>>, vector<1x8x128xf32>
    %55 = vector.shape_cast %54 : vector<1x8x128xf32> to vector<8x128xf32>
    %c0_39 = arith.constant 0 : index
    %c0_40 = arith.constant 0 : index
    %56 = vector.load %arg3[%c0_39, %c0_40] : memref<128x128xf32, #tpu.memory_space<vmem>>, vector<128x128xf32>
    %cst_41 = arith.constant dense<0.000000e+00> : vector<8x128xf32>
    %57 = tpu.matmul %52, %56, %cst_41 {dimension_numbers = #tpu.dot_dimension_numbers<[1], [0], [0], [1], [0, 0, 1, 1], [], []>, precision = #tpu.contract_precision<fp32>} : vector<8x128xf32>, vector<128x128xf32>, vector<8x128xf32> -> vector<8x128xf32>
    %58 = arith.addf %55, %57 : vector<8x128xf32>
    %59 = math.tanh %58 : vector<8x128xf32>
    %c8_i32 = arith.constant 8 : i32
    %c0_42 = arith.constant 0 : index
    %c0_43 = arith.constant 0 : index
    %60 = vector.load %arg7[%c0_42, %c0_43] : memref<8x128xf32, #tpu.memory_space<vmem>>, vector<8x128xf32>
    tpu.vector_store %arg7[%c0_42, %c0_43], %59 {strides = array<i32>} : memref<8x128xf32, #tpu.memory_space<vmem>>, vector<8x128xf32>,
    %c0_i32_44 = arith.constant 0 : i32
    %61 = arith.cmpi eq, %arg1, %c0_i32_44 : i32
    %62 = arith.extui %61 : i1 to i32
    %c0_i32_45 = arith.constant 0 : i32
    %63 = arith.cmpi ne, %62, %c0_i32_45 : i32
    scf.if %63 {
      %c0_46 = arith.constant 0 : index
      %c0_47 = arith.constant 0 : index
      %64 = vector.load %arg4[%c0_46, %c0_47] : memref<128x128xf32, #tpu.memory_space<vmem>>, vector<128x128xf32>
      %cst_48 = arith.constant dense<0.000000e+00> : vector<8x128xf32>
      %65 = tpu.matmul %59, %64, %cst_48 {dimension_numbers = #tpu.dot_dimension_numbers<[1], [0], [0], [1], [0, 0, 1, 1], [], []>, precision = #tpu.contract_precision<fp32>} : vector<8x128xf32>, vector<128x128xf32>, vector<8x128xf32> -> vector<8x128xf32>
      %c0_49 = arith.constant 0 : index
      %c0_50 = arith.constant 0 : index
      %66 = vector.load %arg5[%c0_49, %c0_50] : memref<1x128xf32, #tpu.memory_space<vmem>>, vector<1x128xf32>
      %67 = vector.broadcast %66 : vector<1x128xf32> to vector<8x128xf32>
      %68 = arith.addf %65, %67 : vector<8x128xf32>
      %cst_51 = arith.constant dense<0xFF800000> : vector<8xf32>
      %69 = vector.multi_reduction <maximumf>, %68, %cst_51 [1] : vector<8x128xf32> to vector<8xf32>
      %70 = vector.shape_cast %69 : vector<8xf32> to vector<8x1xf32>
      %71 = vector.broadcast %70 : vector<8x1xf32> to vector<8x128xf32>
      %72 = arith.subf %68, %71 : vector<8x128xf32>
      %73 = math.exp %72 : vector<8x128xf32>
      %cst_52 = arith.constant dense<0.000000e+00> : vector<8xf32>
      %74 = vector.multi_reduction <add>, %73, %cst_52 [1] : vector<8x128xf32> to vector<8xf32>
      %75 = vector.shape_cast %74 : vector<8xf32> to vector<8x1xf32>
      %76 = vector.broadcast %75 : vector<8x1xf32> to vector<8x128xf32>
      %77 = arith.divf %73, %76 : vector<8x128xf32>
      %c0_53 = arith.constant 0 : index
      %c0_54 = arith.constant 0 : index
      %78 = vector.load %arg6[%c0_53, %c0_54] : memref<8x128xf32, #tpu.memory_space<vmem>>, vector<8x128xf32>
      tpu.vector_store %arg6[%c0_53, %c0_54], %77 {strides = array<i32>} : memref<8x128xf32, #tpu.memory_space<vmem>>, vector<8x128xf32>,
    } else {
    }
    return
  }
  func.func @transform_0(%arg0: i32, %arg1: i32) -> (i32, i32, i32) {
    %c0_i32 = arith.constant 0 : i32
    %c0_i32_0 = arith.constant 0 : i32
    return %arg1, %arg0, %c0_i32 : i32, i32, i32
  }
  func.func @transform_1(%arg0: i32, %arg1: i32) -> (i32, i32) {
    %c0_i32 = arith.constant 0 : i32
    %c0_i32_0 = arith.constant 0 : i32
    %c0_i32_1 = arith.constant 0 : i32
    return %c0_i32, %c0_i32_0 : i32, i32
  }
  func.func @transform_2(%arg0: i32, %arg1: i32) -> (i32, i32) {
    %c0_i32 = arith.constant 0 : i32
    %c0_i32_0 = arith.constant 0 : i32
    %c0_i32_1 = arith.constant 0 : i32
    return %c0_i32, %c0_i32_0 : i32, i32
  }
  func.func @transform_3(%arg0: i32, %arg1: i32) -> (i32, i32) {
    %c0_i32 = arith.constant 0 : i32
    %c0_i32_0 = arith.constant 0 : i32
    %c0_i32_1 = arith.constant 0 : i32
    return %c0_i32, %c0_i32_0 : i32, i32
  }
  func.func @transform_4(%arg0: i32, %arg1: i32) -> (i32, i32) {
    %c0_i32 = arith.constant 0 : i32
    %c0_i32_0 = arith.constant 0 : i32
    return %arg0, %c0_i32 : i32, i32
  }
}

</mosaic_0001>

<bundles_post_ra>
// kernel: rnn_forward.1
= control target key start
LH: loop header
LB: loop body
LE: loop exit
PB: predicated region body
PF: predicated region fallthrough
CT: control target
= control target key end

     0   :  { %v10026_v0 = vmov 0.0|0.0   ;;  %vm10027_vm0 = vmmov 0   ;;  %v10028_v4 = vmov 0.0   ;;  %s11501_s1 = inlined_call_operand.vmem [shape: f32[128,128], index: 1, kind: input, shape index: {}]   ;;  %s11502_s0 = inlined_call_operand.vmem [shape: f32[8,8,128], index: 0, kind: input, shape index: {}]   ;;  %s11503_s2 = inlined_call_operand.vmem [shape: f32[128,128], index: 2, kind: input, shape index: {}]   ;;  %s11504_s3 = inlined_call_operand.vmem [shape: f32[1,128], index: 3, kind: input, shape index: {}]   ;;  %s11505_s4 = inlined_call_operand.vmem [shape: f32[8,128], index: 4, kind: output, shape index: {}]  }
   0x1   :  { %8696 = vmatprep.subr.bf16.mxu1 %v10026_v0  ;;  %v24_v1 = vld [vmem:[%s11501_s1] sm:$0xff]  ;;  %v25_v2 = vld [vmem:[%s11501_s1 + $0x8] sm:$0xff]  ;;  %v26_v3 = vld [vmem:[%s11501_s1 + $0x10] sm:$0xff]  ;;  %6838 = vmatprep.mubr.msk.f32.mxu1 %vm10027_vm0, %v10028_v4 }
   0x2   :  { %v41_v5 = vand.u32 4294901760, %v24_v1  ;;  %v44_v6 = vand.u32 4294901760, %v25_v2  ;;  %v27_v7 = vld [vmem:[%s11501_s1 + $0x18] sm:$0xff]  ;;  %v47_v8 = vand.u32 4294901760, %v26_v3  ;;  %8840 = vmatprep.subr.bf16.mxu0 %v10026_v0  ;;  %7048 = vmatprep.mubr.msk.f32.mxu0 %vm10027_vm0, %v10028_v4  ;;  %v28_v10 = vld [vmem:[%s11501_s1 + $0x20] sm:$0xff]  ;;  %v29_v11 = vld [vmem:[%s11501_s1 + $0x28] sm:$0xff] }
   0x3   :  { %v50_v9 = vand.u32 4294901760, %v27_v7  ;;  %v53_v14 = vand.u32 4294901760, %v28_v10  ;;  %v56_v15 = vand.u32 4294901760, %v29_v11  ;;  %v30_v16 = vld [vmem:[%s11501_s1 + $0x30] sm:$0xff]  ;;  %v31_v17 = vld [vmem:[%s11501_s1 + $0x38] sm:$0xff]  ;;  %v32_v21 = vld [vmem:[%s11501_s1 + $0x40] sm:$0xff] }
   0x4   :  { %v10078_v12 = vpack.c.bf16 %v44_v6, %v41_v5  ;;  %v59_v19 = vand.u32 4294901760, %v30_v16  ;;  %v62_v20 = vand.u32 4294901760, %v31_v17  ;;  %v33_v22 = vld [vmem:[%s11501_s1 + $0x48] sm:$0xff]  ;;  %v34_v23 = vld [vmem:[%s11501_s1 + $0x50] sm:$0xff]  ;;  %v35_v24 = vld [vmem:[%s11501_s1 + $0x58] sm:$0xff]  ;;  %v65_v29 = vand.u32 4294901760, %v32_v21 }
   0x5   :  { %v10081_v13 = vpack.c.bf16 %v50_v9, %v47_v8  ;;  %v10093_v18 = vpack.c.bf16 %v56_v15, %v53_v14  ;;  %v36_v25 = vld [vmem:[%s11501_s1 + $0x60] sm:$0xff]  ;;  %v37_v26 = vld [vmem:[%s11501_s1 + $0x68] sm:$0xff]  ;;  %v38_v27 = vld [vmem:[%s11501_s1 + $0x70] sm:$0xff]  ;;  %v68_v31 = vand.u32 4294901760, %v33_v22  ;;  %v71_v32 = vand.u32 4294901760, %v34_v23 }
   0x6   :  { %8698 = vmatpush3.bf16.msra.mxu1 %v10078_v12  ;;  %8842 = vmatpush3.bf16.msra.mxu0 %v10078_v12  ;;  %v39_v28 = vld [vmem:[%s11501_s1 + $0x78] sm:$0xff]  ;;  %v10123_v30 = vpack.c.bf16 %v62_v20, %v59_v19  ;;  %v74_v33 = vand.u32 4294901760, %v35_v24  ;;  %v77_v34 = vand.u32 4294901760, %v36_v25  ;;  %v80_v35 = vand.u32 4294901760, %v37_v26 }
   0x7   :  { %8699 = vmatprep.subr.bf16.mxu1 %v10026_v0  ;;  %8843 = vmatprep.subr.bf16.mxu0 %v10026_v0  ;;  %v83_v36 = vand.u32 4294901760, %v38_v27  ;;  %v86_v37 = vand.u32 4294901760, %v39_v28  ;;  %v10128_v38 = vsub.f32 %v24_v1, %v41_v5  ;;  %v10130_v39 = vsub.f32 %v25_v2, %v44_v6 }
   0x8   :  { %v10132_v40 = vsub.f32 %v26_v3, %v47_v8  ;;  %v10135_v41 = vpack.c.bf16 %v68_v31, %v65_v29  ;;  %v10139_v42 = vpack.c.bf16 %v74_v33, %v71_v32  ;;  %v10141_v43 = vpack.c.bf16 %v80_v35, %v77_v34 }
   0x9   :  { %v10143_v44 = vpack.c.bf16 %v86_v37, %v83_v36  ;;  %v134_v45 = vand.u32 4294901760, %v10128_v38  ;;  %v141_v46 = vand.u32 4294901760, %v10130_v39  ;;  %v10148_v47 = vsub.f32 %v27_v7, %v50_v9 }
   0xa   :  { %8701 = vmatpush3.bf16.msra.mxu1 %v10081_v13  ;;  %8845 = vmatpush3.bf16.msra.mxu0 %v10081_v13  ;;  %v10150_v48 = vsub.f32 %v28_v10, %v53_v14  ;;  %v148_v49 = vand.u32 4294901760, %v10132_v40  ;;  %v10153_v50 = vsub.f32 %v29_v11, %v56_v15  ;;  %v10155_v51 = vsub.f32 %v30_v16, %v59_v19 }
   0xb   :  { %8702 = vmatprep.subr.bf16.mxu1 %v10026_v0  ;;  %8846 = vmatprep.subr.bf16.mxu0 %v10026_v0  ;;  %v10157_v52 = vsub.f32 %v31_v17, %v62_v20  ;;  %v10160_v53 = vsub.f32 %v32_v21, %v65_v29  ;;  %v10162_v54 = vsub.f32 %v33_v22, %v68_v31  ;;  %v155_v60 = vand.u32 4294901760, %v10148_v47 }
   0xc   :  { %v10164_v55 = vsub.f32 %v34_v23, %v71_v32  ;;  %v10168_v56 = vsub.f32 %v35_v24, %v74_v33  ;;  %v10170_v57 = vsub.f32 %v36_v25, %v77_v34  ;;  %v10172_v58 = vsub.f32 %v37_v26, %v80_v35 }
   0xd   :  { %v135_v59 = vsub.f32 %v10128_v38, %v134_v45  ;;  %v162_v61 = vand.u32 4294901760, %v10150_v48  ;;  %v10178_v62 = vsub.f32 %v38_v27, %v83_v36  ;;  %v142_v63 = vsub.f32 %v10130_v39, %v141_v46 }
   0xe   :  { %8704 = vmatpush3.bf16.msra.mxu1 %v10093_v18  ;;  %8848 = vmatpush3.bf16.msra.mxu0 %v10093_v18  ;;  %v149_v1 = vsub.f32 %v10132_v40, %v148_v49  ;;  %v169_v2 = vand.u32 4294901760, %v10153_v50  ;;  %v10183_v3 = vsub.f32 %v39_v28, %v86_v37  ;;  %v176_v5 = vand.u32 4294901760, %v10155_v51 }
   0xf   :  { %8705 = vmatprep.subr.bf16.mxu1 %v10026_v0  ;;  %8849 = vmatprep.subr.bf16.mxu0 %v10026_v0  ;;  %v183_v6 = vand.u32 4294901760, %v10157_v52  ;;  %v190_v7 = vand.u32 4294901760, %v10160_v53  ;;  %v197_v8 = vand.u32 4294901760, %v10162_v54  ;;  %v204_v9 = vand.u32 4294901760, %v10164_v55 }
  0x10   :  { %v211_v10 = vand.u32 4294901760, %v10168_v56  ;;  %v218_v11 = vand.u32 4294901760, %v10170_v57  ;;  %v225_v14 = vand.u32 4294901760, %v10172_v58  ;;  %v232_v15 = vand.u32 4294901760, %v10178_v62 }
  0x11   :  { %v10198_v16 = vpack.c.bf16 %v141_v46, %v134_v45  ;;  %v10200_v17 = vpack.c.bf16 %v155_v60, %v148_v49  ;;  %v10202_v19 = vpack.c.bf16 %v169_v2, %v162_v61  ;;  %v239_v20 = vand.u32 4294901760, %v10183_v3 }
  0x12   :  { %8707 = vmatpush3.bf16.msra.mxu1 %v10123_v30  ;;  %8851 = vmatpush3.bf16.msra.mxu0 %v10123_v30  ;;  %v10205_v21 = vpack.c.bf16 %v183_v6, %v176_v5  ;;  %v10207_v22 = vpack.c.bf16 %v197_v8, %v190_v7  ;;  %v10209_v23 = vpack.c.bf16 %v211_v10, %v204_v9  ;;  %v136_v24 = vand.u32 4294901760, %v135_v59 }
  0x13   :  { %8708 = vmatprep.subr.bf16.mxu1 %v10026_v0  ;;  %8852 = vmatprep.subr.bf16.mxu0 %v10026_v0  ;;  %v143_v25 = vand.u32 4294901760, %v142_v63  ;;  %v156_v26 = vsub.f32 %v10148_v47, %v155_v60  ;;  %v10213_v27 = vpack.c.bf16 %v225_v14, %v218_v11  ;;  %v10217_v28 = vpack.c.bf16 %v239_v20, %v232_v15 }
  0x14   :  { %v163_v29 = vsub.f32 %v10150_v48, %v162_v61  ;;  %v150_v32 = vand.u32 4294901760, %v149_v1  ;;  %v170_v34 = vsub.f32 %v10153_v50, %v169_v2  ;;  %v177_v35 = vsub.f32 %v10155_v51, %v176_v5 }
  0x15   :  { %v10222_v31 = vpack.c.bf16 %v143_v25, %v136_v24  ;;  %v157_v33 = vand.u32 4294901760, %v156_v26  ;;  %v184_v36 = vsub.f32 %v10157_v52, %v183_v6  ;;  %v191_v61 = vsub.f32 %v10160_v53, %v190_v7 }
  0x16   :  { %8710 = vmatpush3.bf16.msra.mxu1 %v10135_v41  ;;  %8854 = vmatpush3.bf16.msra.mxu0 %v10135_v41  ;;  %v164_v45 = vand.u32 4294901760, %v163_v29  ;;  %v171_v46 = vand.u32 4294901760, %v170_v34  ;;  %v178_v49 = vand.u32 4294901760, %v177_v35  ;;  %v198_v63 = vsub.f32 %v10162_v54, %v197_v8 }
  0x17   :  { %8711 = vmatprep.subr.bf16.mxu1 %v10026_v0  ;;  %8855 = vmatprep.subr.bf16.mxu0 %v10026_v0  ;;  %v10232_v37 = vpack.c.bf16 %v157_v33, %v150_v32  ;;  %v185_v59 = vand.u32 4294901760, %v184_v36  ;;  %v192_v2 = vand.u32 4294901760, %v191_v61  ;;  %v205_v6 = vsub.f32 %v10164_v55, %v204_v9  ;;  %v23_v61 = vld [vmem:[%s11502_s0] sm:$0xff] }
  0x18   :  { %v10238_v60 = vpack.c.bf16 %v171_v46, %v164_v45  ;;  %v199_v5 = vand.u32 4294901760, %v198_v63  ;;  %v212_v24 = vsub.f32 %v10168_v56, %v211_v10  ;;  %v219_v25 = vsub.f32 %v10170_v57, %v218_v11 }
  0x19   :  { %v10243_v1 = vpack.c.bf16 %v185_v59, %v178_v49  ;;  %v206_v8 = vand.u32 4294901760, %v205_v6  ;;  %v226_v29 = vsub.f32 %v10172_v58, %v225_v14  ;;  %v233_v33 = vsub.f32 %v10178_v62, %v232_v15 }
  0x1a   :  { %8713 = vmatpush3.bf16.msra.mxu1 %v10139_v42  ;;  %8857 = vmatpush3.bf16.msra.mxu0 %v10139_v42  ;;  %v10251_v7 = vpack.c.bf16 %v199_v5, %v192_v2  ;;  %v213_v26 = vand.u32 4294901760, %v212_v24  ;;  %v220_v32 = vand.u32 4294901760, %v219_v25  ;;  %v240_v11 = vsub.f32 %v10183_v3, %v239_v20 }
  0x1b   :  { %8714 = vmatprep.subr.bf16.mxu1 %v10026_v0  ;;  %8858 = vmatprep.subr.bf16.mxu0 %v10026_v0  ;;  %v227_v10 = vand.u32 4294901760, %v226_v29  ;;  %v234_v35 = vand.u32 4294901760, %v233_v33  ;;  %v10272_v15 = vpack.c.bf16 %v10130_v39, %v10128_v38  ;;  %v10279_v20 = vpack.c.bf16 %v10148_v47, %v10132_v40 }
  0x1c   :  { %v10256_v9 = vpack.c.bf16 %v213_v26, %v206_v8  ;;  %v241_v14 = vand.u32 4294901760, %v240_v11  ;;  %v10287_v38 = vpack.c.bf16 %v10153_v50, %v10150_v48  ;;  %v10293_v39 = vpack.c.bf16 %v10157_v52, %v10155_v51 }
  0x1d   :  { %v10262_v34 = vpack.c.bf16 %v227_v10, %v220_v32  ;;  %v10299_v40 = vpack.c.bf16 %v10162_v54, %v10160_v53  ;;  %v10305_v47 = vpack.c.bf16 %v10168_v56, %v10164_v55  ;;  %v10311_v48 = vpack.c.bf16 %v10172_v58, %v10170_v57 }
  0x1e   :  { %8716 = vmatpush3.bf16.msra.mxu1 %v10141_v43  ;;  %8860 = vmatpush3.bf16.msra.mxu0 %v10141_v43  ;;  %v10266_v36 = vpack.c.bf16 %v241_v14, %v234_v35  ;;  %v10317_v50 = vpack.c.bf16 %v10183_v3, %v10178_v62 }
  0x1f   :  { %8717 = vmatprep.subr.bf16.mxu1 %v10026_v0  ;;  %8861 = vmatprep.subr.bf16.mxu0 %v10026_v0 }
  0x22   :  { %8719 = vmatpush3.bf16.msra.mxu1 %v10143_v44  ;;  %8863 = vmatpush3.bf16.msra.mxu0 %v10143_v44 }
  0x23   :  { %8720 = vmatprep.subr.bf16.mxu1 %v10026_v0  ;;  %8888 = vmatprep.subr.bf16.mxu0 %v10026_v0 }
  0x25   :  { %6839 = vmatmul.mubr.f32.vlgmr.msra.gmra.mrb[0].mxu1 %v10028_v4 }
  0x26   :  { %8722 = vmatpush3.bf16.msra.mxu1 %v10222_v31  ;;  %6873 = vmatprep.mubr.msk.f32.mxu1 %vm10027_vm0, %v10028_v4 }
  0x27   :  { %8723 = vmatprep.subr.bf16.mxu1 %v10026_v0 }
  0x2a   :  { %8725 = vmatpush3.bf16.msra.mxu1 %v10232_v37 }
  0x2b   :  { %8726 = vmatprep.subr.bf16.mxu1 %v10026_v0 }
  0x2e   :  { %8728 = vmatpush3.bf16.msra.mxu1 %v10238_v60 }
  0x2f   :  { %8729 = vmatprep.subr.bf16.mxu1 %v10026_v0 }
  0x32   :  { %8731 = vmatpush3.bf16.msra.mxu1 %v10243_v1 }
  0x33   :  { %8732 = vmatprep.subr.bf16.mxu1 %v10026_v0 }
  0x36   :  { %8734 = vmatpush3.bf16.msra.mxu1 %v10251_v7 }
  0x37   :  { %8735 = vmatprep.subr.bf16.mxu1 %v10026_v0 }
  0x3a   :  { %8737 = vmatpush3.bf16.msra.mxu1 %v10256_v9 }
  0x3b   :  { %8738 = vmatprep.subr.bf16.mxu1 %v10026_v0 }
  0x3e   :  { %8740 = vmatpush3.bf16.msra.mxu1 %v10262_v34 }
  0x3f   :  { %8741 = vmatprep.subr.bf16.mxu1 %v10026_v0 }
  0x42   :  { %8743 = vmatpush3.bf16.msra.mxu1 %v10266_v36 }
  0x43   :  { %8744 = vmatprep.subr.bf16.mxu1 %v10026_v0 }
  0x45   :  { %6874 = vmatmul.mubr.f32.vlgmr.msra.gmra.mrb[2].mxu1 %v10028_v4 }
  0x46   :  { %8746 = vmatpush3.bf16.msra.mxu1 %v10272_v15  ;;  %6908 = vmatprep.mubr.msk.f32.mxu1 %vm10027_vm0, %v10028_v4 }
  0x47   :  { %8747 = vmatprep.subr.bf16.mxu1 %v10026_v0 }
  0x4a   :  { %8749 = vmatpush3.bf16.msra.mxu1 %v10279_v20 }
  0x4b   :  { %8750 = vmatprep.subr.bf16.mxu1 %v10026_v0 }
  0x4e   :  { %8752 = vmatpush3.bf16.msra.mxu1 %v10287_v38 }
  0x4f   :  { %8753 = vmatprep.subr.bf16.mxu1 %v10026_v0 }
  0x52   :  { %8755 = vmatpush3.bf16.msra.mxu1 %v10293_v39 }
  0x53   :  { %8756 = vmatprep.subr.bf16.mxu1 %v10026_v0 }
  0x56   :  { %8758 = vmatpush3.bf16.msra.mxu1 %v10299_v40 }
  0x57   :  { %8759 = vmatprep.subr.bf16.mxu1 %v10026_v0 }
  0x5a   :  { %8761 = vmatpush3.bf16.msra.mxu1 %v10305_v47 }
  0x5b   :  { %8762 = vmatprep.subr.bf16.mxu1 %v10026_v0 }
  0x5e   :  { %8764 = vmatpush3.bf16.msra.mxu1 %v10311_v48 }
  0x5f   :  { %8765 = vmatprep.subr.bf16.mxu1 %v10026_v0 }
  0x62   :  { %8767 = vmatpush3.bf16.msra.mxu1 %v10317_v50 }
  0x63   :  { %8768 = vmatprep.subr.bf16.mxu1 %v10026_v0 }
  0x65   :  { %6909 = vmatmul.mubr.f32.vlgmr.msra.gmra.mrb[4].mxu1 %v10028_v4 }
  0x66   :  { %8770 = vmatpush3.bf16.msra.mxu1 %v10078_v12  ;;  %6943 = vmatprep.mubr.msk.f32.mxu1 %vm10027_vm0, %v10028_v4 }
  0x67   :  { %8771 = vmatprep.subr.bf16.mxu1 %v10026_v0 }
  0x6a   :  { %8773 = vmatpush3.bf16.msra.mxu1 %v10081_v13 }
  0x6b   :  { %8774 = vmatprep.subr.bf16.mxu1 %v10026_v0 }
  0x6e   :  { %8776 = vmatpush3.bf16.msra.mxu1 %v10093_v18 }
  0x6f   :  { %8777 = vmatprep.subr.bf16.mxu1 %v10026_v0 }
  0x72   :  { %8779 = vmatpush3.bf16.msra.mxu1 %v10123_v30 }
  0x73   :  { %8780 = vmatprep.subr.bf16.mxu1 %v10026_v0 }
  0x76   :  { %8782 = vmatpush3.bf16.msra.mxu1 %v10135_v41 }
  0x77   :  { %8783 = vmatprep.subr.bf16.mxu1 %v10026_v0 }
  0x7a   :  { %8785 = vmatpush3.bf16.msra.mxu1 %v10139_v42 }
  0x7b   :  { %8786 = vmatprep.subr.bf16.mxu1 %v10026_v0 }
  0x7e   :  { %8788 = vmatpush3.bf16.msra.mxu1 %v10141_v43 }
  0x7f   :  { %8789 = vmatprep.subr.bf16.mxu1 %v10026_v0 }
  0x82   :  { %8791 = vmatpush3.bf16.msra.mxu1 %v10143_v44 }
  0x83   :  { %8792 = vmatprep.subr.bf16.mxu1 %v10026_v0 }
  0x85   :  { %6944 = vmatmul.mubr.f32.vlgmr.msra.gmra.mrb[6].mxu1 %v10028_v4 }
  0x86   :  { %8794 = vmatpush3.bf16.msra.mxu1 %v10198_v16  ;;  %6978 = vmatprep.mubr.msk.f32.mxu1 %vm10027_vm0, %v10028_v4 }
  0x87   :  { %8795 = vmatprep.subr.bf16.mxu1 %v10026_v0 }
  0x8a   :  { %8797 = vmatpush3.bf16.msra.mxu1 %v10200_v17 }
  0x8b   :  { %8798 = vmatprep.subr.bf16.mxu1 %v10026_v0 }
  0x8e   :  { %8800 = vmatpush3.bf16.msra.mxu1 %v10202_v19 }
  0x8f   :  { %8801 = vmatprep.subr.bf16.mxu1 %v10026_v0 }
  0x92   :  { %8803 = vmatpush3.bf16.msra.mxu1 %v10205_v21 }
  0x93   :  { %8804 = vmatprep.subr.bf16.mxu1 %v10026_v0 }
  0x96   :  { %8806 = vmatpush3.bf16.msra.mxu1 %v10207_v22 }
  0x97   :  { %8807 = vmatprep.subr.bf16.mxu1 %v10026_v0 }
  0x9a   :  { %8809 = vmatpush3.bf16.msra.mxu1 %v10209_v23 }
  0x9b   :  { %8810 = vmatprep.subr.bf16.mxu1 %v10026_v0 }
  0x9e   :  { %8812 = vmatpush3.bf16.msra.mxu1 %v10213_v27 }
  0x9f   :  { %8813 = vmatprep.subr.bf16.mxu1 %v10026_v0 }
  0xa2   :  { %8815 = vmatpush3.bf16.msra.mxu1 %v10217_v28 }
  0xa3   :  { %8816 = vmatprep.subr.bf16.mxu1 %v10026_v0 }
  0xa5   :  { %6979 = vmatmul.mubr.f32.vlgmr.msra.gmra.mrb[8].mxu1 %v10028_v4 }
  0xa6   :  { %8818 = vmatpush3.bf16.msra.mxu1 %v10078_v12  ;;  %7013 = vmatprep.mubr.msk.f32.mxu1 %vm10027_vm0, %v10028_v4 }
  0xa7   :  { %8819 = vmatprep.subr.bf16.mxu1 %v10026_v0 }
  0xaa   :  { %8821 = vmatpush3.bf16.msra.mxu1 %v10081_v13 }
  0xab   :  { %8822 = vmatprep.subr.bf16.mxu1 %v10026_v0 }
  0xae   :  { %8824 = vmatpush3.bf16.msra.mxu1 %v10093_v18 }
  0xaf   :  { %8825 = vmatprep.subr.bf16.mxu1 %v10026_v0 }
  0xb2   :  { %8827 = vmatpush3.bf16.msra.mxu1 %v10123_v30 }
  0xb3   :  { %8828 = vmatprep.subr.bf16.mxu1 %v10026_v0 }
  0xb6   :  { %8830 = vmatpush3.bf16.msra.mxu1 %v10135_v41 }
  0xb7   :  { %8831 = vmatprep.subr.bf16.mxu1 %v10026_v0 }
  0xba   :  { %8833 = vmatpush3.bf16.msra.mxu1 %v10139_v42 }
  0xbb   :  { %8834 = vmatprep.subr.bf16.mxu1 %v10026_v0 }
  0xbe   :  { %8836 = vmatpush3.bf16.msra.mxu1 %v10141_v43 }
  0xbf   :  { %8837 = vmatprep.subr.bf16.mxu1 %v10026_v0 }
  0xc2   :  { %8839 = vmatpush3.bf16.msra.mxu1 %v10143_v44 }
  0xc3   :  { %8864 = vmatprep.subr.bf16.mxu1 %v10026_v0 }
  0xc5   :  { %7014 = vmatmul.mubr.f32.vlgmr.msra.gmra.mrb[10].mxu1 %v10028_v4 }
  0xc6   :  { %8866 = vmatpush3.bf16.msra.mxu1 %v10222_v31  ;;  %7083 = vmatprep.mubr.msk.f32.mxu1 %vm10027_vm0, %v10028_v4 }
  0xc7   :  { %8867 = vmatprep.subr.bf16.mxu1 %v10026_v0 }
  0xca   :  { %8869 = vmatpush3.bf16.msra.mxu1 %v10232_v37 }
  0xcb   :  { %8870 = vmatprep.subr.bf16.mxu1 %v10026_v0 }
  0xce   :  { %8872 = vmatpush3.bf16.msra.mxu1 %v10238_v60 }
  0xcf   :  { %8873 = vmatprep.subr.bf16.mxu1 %v10026_v0 }
  0xd2   :  { %8875 = vmatpush3.bf16.msra.mxu1 %v10243_v1 }
  0xd3   :  { %8876 = vmatprep.subr.bf16.mxu1 %v10026_v0 }
  0xd6   :  { %8878 = vmatpush3.bf16.msra.mxu1 %v10251_v7 }
  0xd7   :  { %8879 = vmatprep.subr.bf16.mxu1 %v10026_v0 }
  0xda   :  { %8881 = vmatpush3.bf16.msra.mxu1 %v10256_v9 }
  0xdb   :  { %8882 = vmatprep.subr.bf16.mxu1 %v10026_v0 }
  0xde   :  { %8884 = vmatpush3.bf16.msra.mxu1 %v10262_v34 }
  0xdf   :  { %8885 = vmatprep.subr.bf16.mxu1 %v10026_v0 }
  0xe2   :  { %8887 = vmatpush3.bf16.msra.mxu1 %v10266_v36 }
  0xe3   :  { %8912 = vmatprep.subr.bf16.mxu1 %v10026_v0 }
  0xf8   :  { %v127_v51 = vpop.f32.mrb[0].mxu1 }
  0xf9   :  { %v6840_v52 = vpop.f32.mrb[1].mxu1 }
 0x118   :  { %v278_v53 = vpop.f32.mrb[2].mxu1 }
 0x119   :  { %v279_v54 = vadd.f32 %v278_v53, %v127_v51  ;;  %v6875_v55 = vpop.f32.mrb[3].mxu1 }
 0x138   :  { %v382_v56 = vpop.f32.mrb[4].mxu1 }
 0x139   :  { %v383_v57 = vadd.f32 %v382_v56, %v279_v54  ;;  %v6910_v58 = vpop.f32.mrb[5].mxu1 }
 0x158   :  { %v471_v62 = vpop.f32.mrb[6].mxu1 }
 0x159   :  { %v472_v3 = vadd.f32 %v471_v62, %v383_v57  ;;  %v6945_v45 = vpop.f32.mrb[7].mxu1 }
 0x178   :  { %v590_v46 = vpop.f32.mrb[8].mxu1 }
 0x179   :  { %v591_v49 = vadd.f32 %v590_v46, %v472_v3  ;;  %v6980_v59 = vpop.f32.mrb[9].mxu1  ;;  %v5880_v46 = vld [vmem:[%s11502_s0 + $0x8] sm:$0xff] }
 0x198   :  { %v677_v63 = vpop.f32.mrb[10].mxu1 }
 0x199   :  { %v678_v2 = vadd.f32 %v677_v63, %v591_v49  ;;  %v7015_v5 = vpop.f32.mrb[11].mxu1 }
 0x19b   :  { %v681_v6 = vadd.f32 %v678_v2, %v23_v61 }
 0x19d   :  { %10006 = vtanh.f32 %v681_v6 }
 0x1a7   :  { %v10007_v24 = vpop.eup %10006 }
 0x1a8   :  { %v10401_v25 = vand.u32 4294901760, %v10007_v24 }
 0x1aa   :  { %7084 = vmatmul.mubr.f32.vlgmr.msra.gmra.mrb[12].mxu1 %v10401_v25  ;;  %v767_v8 = vsub.f32 %v10007_v24, %v10401_v25 }
 0x1ab   :  { %8914 = vmatpush3.bf16.msra.mxu1 %v10078_v12  ;;  %7153 = vmatprep.mubr.msk.f32.mxu1 %vm10027_vm0, %v10028_v4 }
 0x1ac   :  { %8915 = vmatprep.subr.bf16.mxu1 %v10026_v0  ;;  %v768_v26 = vand.u32 4294901760, %v767_v8 }
 0x1ae   :  { %v769_v29 = vsub.f32 %v767_v8, %v768_v26 }
 0x1af   :  { %8917 = vmatpush3.bf16.msra.mxu1 %v10081_v13 }
 0x1b0   :  { %8918 = vmatprep.subr.bf16.mxu1 %v10026_v0  ;;  %v770_v32 = vand.u32 4294901760, %v769_v29 }
 0x1b2   :  { %7049 = vmatmul.mubr.f32.vlgmr.msra.gmra.mrb[0].mxu0 %v770_v32 }
 0x1b3   :  { %8890 = vmatpush3.bf16.msra.mxu0 %v10272_v15  ;;  %8920 = vmatpush3.bf16.msra.mxu1 %v10093_v18 }
 0x1b4   :  { %8891 = vmatprep.subr.bf16.mxu0 %v10026_v0  ;;  %8921 = vmatprep.subr.bf16.mxu1 %v10026_v0 }
 0x1b5   :  { %7118 = vmatprep.mubr.msk.f32.mxu0 %vm10027_vm0, %v10028_v4 }
 0x1b7   :  { %8893 = vmatpush3.bf16.msra.mxu0 %v10279_v20  ;;  %8923 = vmatpush3.bf16.msra.mxu1 %v10123_v30 }
 0x1b8   :  { %8894 = vmatprep.subr.bf16.mxu0 %v10026_v0  ;;  %8924 = vmatprep.subr.bf16.mxu1 %v10026_v0 }
 0x1bb   :  { %8896 = vmatpush3.bf16.msra.mxu0 %v10287_v38  ;;  %8926 = vmatpush3.bf16.msra.mxu1 %v10135_v41 }
 0x1bc   :  { %8897 = vmatprep.subr.bf16.mxu0 %v10026_v0  ;;  %8927 = vmatprep.subr.bf16.mxu1 %v10026_v0 }
 0x1bf   :  { %8899 = vmatpush3.bf16.msra.mxu0 %v10293_v39  ;;  %8929 = vmatpush3.bf16.msra.mxu1 %v10139_v42 }
 0x1c0   :  { %8900 = vmatprep.subr.bf16.mxu0 %v10026_v0  ;;  %8930 = vmatprep.subr.bf16.mxu1 %v10026_v0 }
 0x1c3   :  { %8902 = vmatpush3.bf16.msra.mxu0 %v10299_v40  ;;  %8932 = vmatpush3.bf16.msra.mxu1 %v10141_v43 }
 0x1c4   :  { %8903 = vmatprep.subr.bf16.mxu0 %v10026_v0  ;;  %8933 = vmatprep.subr.bf16.mxu1 %v10026_v0 }
 0x1c7   :  { %8905 = vmatpush3.bf16.msra.mxu0 %v10305_v47  ;;  %8935 = vmatpush3.bf16.msra.mxu1 %v10143_v44 }
 0x1c8   :  { %8906 = vmatprep.subr.bf16.mxu0 %v10026_v0  ;;  %8960 = vmatprep.subr.bf16.mxu1 %v10026_v0 }
 0x1ca   :  { %7154 = vmatmul.mubr.f32.vlgmr.msra.gmra.mrb[14].mxu1 %v768_v26 }
 0x1cb   :  { %8908 = vmatpush3.bf16.msra.mxu0 %v10311_v48  ;;  %8962 = vmatpush3.bf16.msra.mxu1 %v10078_v12 }
 0x1cc   :  { %8909 = vmatprep.subr.bf16.mxu0 %v10026_v0  ;;  %8963 = vmatprep.subr.bf16.mxu1 %v10026_v0 }
 0x1cd   :  { %7223 = vmatprep.mubr.msk.f32.mxu1 %vm10027_vm0, %v10028_v4 }
 0x1cf   :  { %8911 = vmatpush3.bf16.msra.mxu0 %v10317_v50  ;;  %8965 = vmatpush3.bf16.msra.mxu1 %v10081_v13 }
 0x1d0   :  { %8936 = vmatprep.subr.bf16.mxu0 %v10026_v0  ;;  %8966 = vmatprep.subr.bf16.mxu1 %v10026_v0 }
 0x1d2   :  { %7119 = vmatmul.mubr.f32.vlgmr.msra.gmra.mrb[2].mxu0 %v767_v8 }
 0x1d3   :  { %8938 = vmatpush3.bf16.msra.mxu0 %v10198_v16  ;;  %8968 = vmatpush3.bf16.msra.mxu1 %v10093_v18 }
 0x1d4   :  { %8939 = vmatprep.subr.bf16.mxu0 %v10026_v0  ;;  %8969 = vmatprep.subr.bf16.mxu1 %v10026_v0 }
 0x1d5   :  { %7188 = vmatprep.mubr.msk.f32.mxu0 %vm10027_vm0, %v10028_v4 }
 0x1d7   :  { %8941 = vmatpush3.bf16.msra.mxu0 %v10200_v17  ;;  %8971 = vmatpush3.bf16.msra.mxu1 %v10123_v30 }
 0x1d8   :  { %8942 = vmatprep.subr.bf16.mxu0 %v10026_v0  ;;  %8972 = vmatprep.subr.bf16.mxu1 %v10026_v0 }
 0x1db   :  { %8944 = vmatpush3.bf16.msra.mxu0 %v10202_v19  ;;  %8974 = vmatpush3.bf16.msra.mxu1 %v10135_v41 }
 0x1dc   :  { %8945 = vmatprep.subr.bf16.mxu0 %v10026_v0  ;;  %8975 = vmatprep.subr.bf16.mxu1 %v10026_v0 }
 0x1df   :  { %8947 = vmatpush3.bf16.msra.mxu0 %v10205_v21  ;;  %8977 = vmatpush3.bf16.msra.mxu1 %v10139_v42 }
 0x1e0   :  { %8948 = vmatprep.subr.bf16.mxu0 %v10026_v0  ;;  %8978 = vmatprep.subr.bf16.mxu1 %v10026_v0 }
 0x1e3   :  { %8950 = vmatpush3.bf16.msra.mxu0 %v10207_v22  ;;  %8980 = vmatpush3.bf16.msra.mxu1 %v10141_v43 }
 0x1e4   :  { %8951 = vmatprep.subr.bf16.mxu0 %v10026_v0  ;;  %8981 = vmatprep.subr.bf16.mxu1 %v10026_v0 }
 0x1e7   :  { %8953 = vmatpush3.bf16.msra.mxu0 %v10209_v23  ;;  %8983 = vmatpush3.bf16.msra.mxu1 %v10143_v44 }
 0x1e8   :  { %8954 = vmatprep.subr.bf16.mxu0 %v10026_v0  ;;  %9008 = vmatprep.subr.bf16.mxu1 %v10026_v0 }
 0x1ea   :  { %7224 = vmatmul.mubr.f32.vlgmr.msra.gmra.mrb[16].mxu1 %v10401_v25 }
 0x1eb   :  { %8956 = vmatpush3.bf16.msra.mxu0 %v10213_v27  ;;  %9010 = vmatpush3.bf16.msra.mxu1 %v10222_v31 }
 0x1ec   :  { %8957 = vmatprep.subr.bf16.mxu0 %v10026_v0  ;;  %9011 = vmatprep.subr.bf16.mxu1 %v10026_v0 }
 0x1ed   :  { %7293 = vmatprep.mubr.msk.f32.mxu1 %vm10027_vm0, %v10028_v4 }
 0x1ef   :  { %8959 = vmatpush3.bf16.msra.mxu0 %v10217_v28  ;;  %9013 = vmatpush3.bf16.msra.mxu1 %v10232_v37 }
 0x1f0   :  { %8984 = vmatprep.subr.bf16.mxu0 %v10026_v0  ;;  %9014 = vmatprep.subr.bf16.mxu1 %v10026_v0 }
 0x1f2   :  { %7189 = vmatmul.mubr.f32.vlgmr.msra.gmra.mrb[4].mxu0 %v10401_v25 }
 0x1f3   :  { %8986 = vmatpush3.bf16.msra.mxu0 %v10078_v12  ;;  %9016 = vmatpush3.bf16.msra.mxu1 %v10238_v60 }
 0x1f4   :  { %8987 = vmatprep.subr.bf16.mxu0 %v10026_v0  ;;  %9017 = vmatprep.subr.bf16.mxu1 %v10026_v0 }
 0x1f5   :  { %7258 = vmatprep.mubr.msk.f32.mxu0 %vm10027_vm0, %v10028_v4 }
 0x1f7   :  { %8989 = vmatpush3.bf16.msra.mxu0 %v10081_v13  ;;  %9019 = vmatpush3.bf16.msra.mxu1 %v10243_v1 }
 0x1f8   :  { %8990 = vmatprep.subr.bf16.mxu0 %v10026_v0  ;;  %9020 = vmatprep.subr.bf16.mxu1 %v10026_v0 }
 0x1fb   :  { %8992 = vmatpush3.bf16.msra.mxu0 %v10093_v18  ;;  %9022 = vmatpush3.bf16.msra.mxu1 %v10251_v7 }
 0x1fc   :  { %8993 = vmatprep.subr.bf16.mxu0 %v10026_v0  ;;  %9023 = vmatprep.subr.bf16.mxu1 %v10026_v0 }
 0x1ff   :  { %8995 = vmatpush3.bf16.msra.mxu0 %v10123_v30  ;;  %9025 = vmatpush3.bf16.msra.mxu1 %v10256_v9 }
 0x200   :  { %8996 = vmatprep.subr.bf16.mxu0 %v10026_v0  ;;  %9026 = vmatprep.subr.bf16.mxu1 %v10026_v0 }
 0x203   :  { %8998 = vmatpush3.bf16.msra.mxu0 %v10135_v41  ;;  %9028 = vmatpush3.bf16.msra.mxu1 %v10262_v34 }
 0x204   :  { %8999 = vmatprep.subr.bf16.mxu0 %v10026_v0  ;;  %9029 = vmatprep.subr.bf16.mxu1 %v10026_v0 }
 0x207   :  { %9001 = vmatpush3.bf16.msra.mxu0 %v10139_v42  ;;  %9031 = vmatpush3.bf16.msra.mxu1 %v10266_v36 }
 0x208   :  { %9002 = vmatprep.subr.bf16.mxu0 %v10026_v0  ;;  %9056 = vmatprep.subr.bf16.mxu1 %v10026_v0 }
 0x20b   :  { %9004 = vmatpush3.bf16.msra.mxu0 %v10141_v43 }
 0x20c   :  { %9005 = vmatprep.subr.bf16.mxu0 %v10026_v0 }
 0x20f   :  { %9007 = vmatpush3.bf16.msra.mxu0 %v10143_v44 }
 0x210   :  { %9032 = vmatprep.subr.bf16.mxu0 %v10026_v0 }
 0x27d   :  { %v923_v10 = vpop.f32.mrb[12].mxu1 }
 0x27e   :  { %v7085_v33 = vpop.f32.mrb[13].mxu1 }
 0x285   :  { %v772_v11 = vpop.f32.mrb[0].mxu0 }
 0x286   :  { %v924_v35 = vadd.f32 %v923_v10, %v772_v11  ;;  %v7050_v14 = vpop.f32.mrb[1].mxu0 }
 0x29d   :  { %v1116_v51 = vpop.f32.mrb[14].mxu1 }
 0x29e   :  { %v7155_v52 = vpop.f32.mrb[15].mxu1 }
 0x2a5   :  { %v1027_v53 = vpop.f32.mrb[2].mxu0 }
 0x2a6   :  { %v1028_v54 = vadd.f32 %v1027_v53, %v924_v35  ;;  %v7120_v55 = vpop.f32.mrb[3].mxu0 }
 0x2a8   :  { %v1117_v56 = vadd.f32 %v1116_v51, %v1028_v54 }
 0x2bd   :  { %v1322_v57 = vpop.f32.mrb[16].mxu1 }
 0x2be   :  { %v7225_v58 = vpop.f32.mrb[17].mxu1 }
 0x2c5   :  { %v1235_v62 = vpop.f32.mrb[4].mxu0 }
 0x2c6   :  { %v1236_v3 = vadd.f32 %v1235_v62, %v1117_v56  ;;  %v7190_v45 = vpop.f32.mrb[5].mxu0 }
 0x2c8   :  { %v1323_v49 = vadd.f32 %v1322_v57, %v1236_v3  ;;  %v5881_v57 = vld [vmem:[%s11502_s0 + $0x10] sm:$0xff] }
 0x2ca   :  { %v1326_v59 = vadd.f32 %v5880_v46, %v1323_v49 }
 0x2cc   :  { %10008 = vtanh.f32 %v1326_v59 }
 0x2d6   :  { %v10009_v61 = vpop.eup %10008 }
 0x2d7   :  { %v10518_v63 = vand.u32 4294901760, %v10009_v61 }
 0x2d9   :  { %7294 = vmatmul.mubr.f32.vlgmr.msra.gmra.mrb[18].mxu1 %v10518_v63  ;;  %v1412_v2 = vsub.f32 %v10009_v61, %v10518_v63 }
 0x2da   :  { %9058 = vmatpush3.bf16.msra.mxu1 %v10078_v12  ;;  %7363 = vmatprep.mubr.msk.f32.mxu1 %vm10027_vm0, %v10028_v4 }
 0x2db   :  { %9059 = vmatprep.subr.bf16.mxu1 %v10026_v0  ;;  %v1413_v5 = vand.u32 4294901760, %v1412_v2 }
 0x2dd   :  { %v1414_v6 = vsub.f32 %v1412_v2, %v1413_v5 }
 0x2de   :  { %9061 = vmatpush3.bf16.msra.mxu1 %v10081_v13 }
 0x2df   :  { %9062 = vmatprep.subr.bf16.mxu1 %v10026_v0  ;;  %v1415_v24 = vand.u32 4294901760, %v1414_v6 }
 0x2e1   :  { %7259 = vmatmul.mubr.f32.vlgmr.msra.gmra.mrb[6].mxu0 %v1415_v24 }
 0x2e2   :  { %9034 = vmatpush3.bf16.msra.mxu0 %v10272_v15  ;;  %9064 = vmatpush3.bf16.msra.mxu1 %v10093_v18 }
 0x2e3   :  { %9035 = vmatprep.subr.bf16.mxu0 %v10026_v0  ;;  %9065 = vmatprep.subr.bf16.mxu1 %v10026_v0 }
 0x2e4   :  { %7328 = vmatprep.mubr.msk.f32.mxu0 %vm10027_vm0, %v10028_v4 }
 0x2e6   :  { %9037 = vmatpush3.bf16.msra.mxu0 %v10279_v20  ;;  %9067 = vmatpush3.bf16.msra.mxu1 %v10123_v30 }
 0x2e7   :  { %9038 = vmatprep.subr.bf16.mxu0 %v10026_v0  ;;  %9068 = vmatprep.subr.bf16.mxu1 %v10026_v0 }
 0x2ea   :  { %9040 = vmatpush3.bf16.msra.mxu0 %v10287_v38  ;;  %9070 = vmatpush3.bf16.msra.mxu1 %v10135_v41 }
 0x2eb   :  { %9041 = vmatprep.subr.bf16.mxu0 %v10026_v0  ;;  %9071 = vmatprep.subr.bf16.mxu1 %v10026_v0 }
 0x2ee   :  { %9043 = vmatpush3.bf16.msra.mxu0 %v10293_v39  ;;  %9073 = vmatpush3.bf16.msra.mxu1 %v10139_v42 }
 0x2ef   :  { %9044 = vmatprep.subr.bf16.mxu0 %v10026_v0  ;;  %9074 = vmatprep.subr.bf16.mxu1 %v10026_v0 }
 0x2f2   :  { %9046 = vmatpush3.bf16.msra.mxu0 %v10299_v40  ;;  %9076 = vmatpush3.bf16.msra.mxu1 %v10141_v43 }
 0x2f3   :  { %9047 = vmatprep.subr.bf16.mxu0 %v10026_v0  ;;  %9077 = vmatprep.subr.bf16.mxu1 %v10026_v0 }
 0x2f6   :  { %9049 = vmatpush3.bf16.msra.mxu0 %v10305_v47  ;;  %9079 = vmatpush3.bf16.msra.mxu1 %v10143_v44 }
 0x2f7   :  { %9050 = vmatprep.subr.bf16.mxu0 %v10026_v0  ;;  %9104 = vmatprep.subr.bf16.mxu1 %v10026_v0 }
 0x2f9   :  { %7364 = vmatmul.mubr.f32.vlgmr.msra.gmra.mrb[20].mxu1 %v1413_v5 }
 0x2fa   :  { %9052 = vmatpush3.bf16.msra.mxu0 %v10311_v48  ;;  %9106 = vmatpush3.bf16.msra.mxu1 %v10078_v12 }
 0x2fb   :  { %9053 = vmatprep.subr.bf16.mxu0 %v10026_v0  ;;  %9107 = vmatprep.subr.bf16.mxu1 %v10026_v0 }
 0x2fc   :  { %7433 = vmatprep.mubr.msk.f32.mxu1 %vm10027_vm0, %v10028_v4 }
 0x2fe   :  { %9055 = vmatpush3.bf16.msra.mxu0 %v10317_v50  ;;  %9109 = vmatpush3.bf16.msra.mxu1 %v10081_v13 }
 0x2ff   :  { %9080 = vmatprep.subr.bf16.mxu0 %v10026_v0  ;;  %9110 = vmatprep.subr.bf16.mxu1 %v10026_v0 }
 0x301   :  { %7329 = vmatmul.mubr.f32.vlgmr.msra.gmra.mrb[8].mxu0 %v1412_v2 }
 0x302   :  { %9082 = vmatpush3.bf16.msra.mxu0 %v10198_v16  ;;  %9112 = vmatpush3.bf16.msra.mxu1 %v10093_v18 }
 0x303   :  { %9083 = vmatprep.subr.bf16.mxu0 %v10026_v0  ;;  %9113 = vmatprep.subr.bf16.mxu1 %v10026_v0 }
 0x304   :  { %7398 = vmatprep.mubr.msk.f32.mxu0 %vm10027_vm0, %v10028_v4 }
 0x306   :  { %9085 = vmatpush3.bf16.msra.mxu0 %v10200_v17  ;;  %9115 = vmatpush3.bf16.msra.mxu1 %v10123_v30 }
 0x307   :  { %9086 = vmatprep.subr.bf16.mxu0 %v10026_v0  ;;  %9116 = vmatprep.subr.bf16.mxu1 %v10026_v0 }
 0x30a   :  { %9088 = vmatpush3.bf16.msra.mxu0 %v10202_v19  ;;  %9118 = vmatpush3.bf16.msra.mxu1 %v10135_v41 }
 0x30b   :  { %9089 = vmatprep.subr.bf16.mxu0 %v10026_v0  ;;  %9119 = vmatprep.subr.bf16.mxu1 %v10026_v0 }
 0x30e   :  { %9091 = vmatpush3.bf16.msra.mxu0 %v10205_v21  ;;  %9121 = vmatpush3.bf16.msra.mxu1 %v10139_v42 }
 0x30f   :  { %9092 = vmatprep.subr.bf16.mxu0 %v10026_v0  ;;  %9122 = vmatprep.subr.bf16.mxu1 %v10026_v0 }
 0x312   :  { %9094 = vmatpush3.bf16.msra.mxu0 %v10207_v22  ;;  %9124 = vmatpush3.bf16.msra.mxu1 %v10141_v43 }
 0x313   :  { %9095 = vmatprep.subr.bf16.mxu0 %v10026_v0  ;;  %9125 = vmatprep.subr.bf16.mxu1 %v10026_v0 }
 0x316   :  { %9097 = vmatpush3.bf16.msra.mxu0 %v10209_v23  ;;  %9127 = vmatpush3.bf16.msra.mxu1 %v10143_v44 }
 0x317   :  { %9098 = vmatprep.subr.bf16.mxu0 %v10026_v0  ;;  %9152 = vmatprep.subr.bf16.mxu1 %v10026_v0 }
 0x319   :  { %7434 = vmatmul.mubr.f32.vlgmr.msra.gmra.mrb[22].mxu1 %v10518_v63 }
 0x31a   :  { %9100 = vmatpush3.bf16.msra.mxu0 %v10213_v27  ;;  %9154 = vmatpush3.bf16.msra.mxu1 %v10222_v31 }
 0x31b   :  { %9101 = vmatprep.subr.bf16.mxu0 %v10026_v0  ;;  %9155 = vmatprep.subr.bf16.mxu1 %v10026_v0 }
 0x31c   :  { %7503 = vmatprep.mubr.msk.f32.mxu1 %vm10027_vm0, %v10028_v4 }
 0x31e   :  { %9103 = vmatpush3.bf16.msra.mxu0 %v10217_v28  ;;  %9157 = vmatpush3.bf16.msra.mxu1 %v10232_v37 }
 0x31f   :  { %9128 = vmatprep.subr.bf16.mxu0 %v10026_v0  ;;  %9158 = vmatprep.subr.bf16.mxu1 %v10026_v0 }
 0x321   :  { %7399 = vmatmul.mubr.f32.vlgmr.msra.gmra.mrb[10].mxu0 %v10518_v63 }
 0x322   :  { %9130 = vmatpush3.bf16.msra.mxu0 %v10078_v12  ;;  %9160 = vmatpush3.bf16.msra.mxu1 %v10238_v60 }
 0x323   :  { %9131 = vmatprep.subr.bf16.mxu0 %v10026_v0  ;;  %9161 = vmatprep.subr.bf16.mxu1 %v10026_v0 }
 0x324   :  { %7468 = vmatprep.mubr.msk.f32.mxu0 %vm10027_vm0, %v10028_v4 }
 0x326   :  { %9133 = vmatpush3.bf16.msra.mxu0 %v10081_v13  ;;  %9163 = vmatpush3.bf16.msra.mxu1 %v10243_v1 }
 0x327   :  { %9134 = vmatprep.subr.bf16.mxu0 %v10026_v0  ;;  %9164 = vmatprep.subr.bf16.mxu1 %v10026_v0 }
 0x32a   :  { %9136 = vmatpush3.bf16.msra.mxu0 %v10093_v18  ;;  %9166 = vmatpush3.bf16.msra.mxu1 %v10251_v7 }
 0x32b   :  { %9137 = vmatprep.subr.bf16.mxu0 %v10026_v0  ;;  %9167 = vmatprep.subr.bf16.mxu1 %v10026_v0 }
 0x32e   :  { %9139 = vmatpush3.bf16.msra.mxu0 %v10123_v30  ;;  %9169 = vmatpush3.bf16.msra.mxu1 %v10256_v9 }
 0x32f   :  { %9140 = vmatprep.subr.bf16.mxu0 %v10026_v0  ;;  %9170 = vmatprep.subr.bf16.mxu1 %v10026_v0 }
 0x332   :  { %9142 = vmatpush3.bf16.msra.mxu0 %v10135_v41  ;;  %9172 = vmatpush3.bf16.msra.mxu1 %v10262_v34 }
 0x333   :  { %9143 = vmatprep.subr.bf16.mxu0 %v10026_v0  ;;  %9173 = vmatprep.subr.bf16.mxu1 %v10026_v0 }
 0x336   :  { %9145 = vmatpush3.bf16.msra.mxu0 %v10139_v42  ;;  %9175 = vmatpush3.bf16.msra.mxu1 %v10266_v36 }
 0x337   :  { %9146 = vmatprep.subr.bf16.mxu0 %v10026_v0  ;;  %9200 = vmatprep.subr.bf16.mxu1 %v10026_v0 }
 0x33a   :  { %9148 = vmatpush3.bf16.msra.mxu0 %v10141_v43 }
 0x33b   :  { %9149 = vmatprep.subr.bf16.mxu0 %v10026_v0 }
 0x33e   :  { %9151 = vmatpush3.bf16.msra.mxu0 %v10143_v44 }
 0x33f   :  { %9176 = vmatprep.subr.bf16.mxu0 %v10026_v0 }
 0x3ac   :  { %v1568_v25 = vpop.f32.mrb[18].mxu1 }
 0x3ad   :  { %v7295_v8 = vpop.f32.mrb[19].mxu1 }
 0x3b4   :  { %v1417_v26 = vpop.f32.mrb[6].mxu0 }
 0x3b5   :  { %v1569_v29 = vadd.f32 %v1568_v25, %v1417_v26  ;;  %v7260_v32 = vpop.f32.mrb[7].mxu0 }
 0x3cc   :  { %v1761_v10 = vpop.f32.mrb[20].mxu1 }
 0x3cd   :  { %v7365_v33 = vpop.f32.mrb[21].mxu1 }
 0x3d4   :  { %v1672_v11 = vpop.f32.mrb[8].mxu0 }
 0x3d5   :  { %v1673_v35 = vadd.f32 %v1672_v11, %v1569_v29  ;;  %v7330_v14 = vpop.f32.mrb[9].mxu0 }
 0x3d7   :  { %v1762_v51 = vadd.f32 %v1761_v10, %v1673_v35 }
 0x3ec   :  { %v1967_v52 = vpop.f32.mrb[22].mxu1 }
 0x3ed   :  { %v7435_v53 = vpop.f32.mrb[23].mxu1 }
 0x3f4   :  { %v1880_v54 = vpop.f32.mrb[10].mxu0 }
 0x3f5   :  { %v1881_v55 = vadd.f32 %v1880_v54, %v1762_v51  ;;  %v7400_v56 = vpop.f32.mrb[11].mxu0 }
 0x3f7   :  { %v1968_v58 = vadd.f32 %v1967_v52, %v1881_v55  ;;  %v5882_v52 = vld [vmem:[%s11502_s0 + $0x18] sm:$0xff] }
 0x3f9   :  { %v1971_v62 = vadd.f32 %v5881_v57, %v1968_v58 }
 0x3fb   :  { %10010 = vtanh.f32 %v1971_v62 }
 0x405   :  { %v10011_v3 = vpop.eup %10010 }
 0x406   :  { %v10635_v45 = vand.u32 4294901760, %v10011_v3 }
 0x408   :  { %7504 = vmatmul.mubr.f32.vlgmr.msra.gmra.mrb[24].mxu1 %v10635_v45  ;;  %v2057_v46 = vsub.f32 %v10011_v3, %v10635_v45 }
 0x409   :  { %9202 = vmatpush3.bf16.msra.mxu1 %v10078_v12  ;;  %7573 = vmatprep.mubr.msk.f32.mxu1 %vm10027_vm0, %v10028_v4 }
 0x40a   :  { %9203 = vmatprep.subr.bf16.mxu1 %v10026_v0  ;;  %v2058_v49 = vand.u32 4294901760, %v2057_v46 }
 0x40c   :  { %v2059_v59 = vsub.f32 %v2057_v46, %v2058_v49 }
 0x40d   :  { %9205 = vmatpush3.bf16.msra.mxu1 %v10081_v13 }
 0x40e   :  { %9206 = vmatprep.subr.bf16.mxu1 %v10026_v0  ;;  %v2060_v61 = vand.u32 4294901760, %v2059_v59 }
 0x410   :  { %7469 = vmatmul.mubr.f32.vlgmr.msra.gmra.mrb[12].mxu0 %v2060_v61 }
 0x411   :  { %9178 = vmatpush3.bf16.msra.mxu0 %v10272_v15  ;;  %9208 = vmatpush3.bf16.msra.mxu1 %v10093_v18 }
 0x412   :  { %9179 = vmatprep.subr.bf16.mxu0 %v10026_v0  ;;  %9209 = vmatprep.subr.bf16.mxu1 %v10026_v0 }
 0x413   :  { %7538 = vmatprep.mubr.msk.f32.mxu0 %vm10027_vm0, %v10028_v4 }
 0x415   :  { %9181 = vmatpush3.bf16.msra.mxu0 %v10279_v20  ;;  %9211 = vmatpush3.bf16.msra.mxu1 %v10123_v30 }
 0x416   :  { %9182 = vmatprep.subr.bf16.mxu0 %v10026_v0  ;;  %9212 = vmatprep.subr.bf16.mxu1 %v10026_v0 }
 0x419   :  { %9184 = vmatpush3.bf16.msra.mxu0 %v10287_v38  ;;  %9214 = vmatpush3.bf16.msra.mxu1 %v10135_v41 }
 0x41a   :  { %9185 = vmatprep.subr.bf16.mxu0 %v10026_v0  ;;  %9215 = vmatprep.subr.bf16.mxu1 %v10026_v0 }
 0x41d   :  { %9187 = vmatpush3.bf16.msra.mxu0 %v10293_v39  ;;  %9217 = vmatpush3.bf16.msra.mxu1 %v10139_v42 }
 0x41e   :  { %9188 = vmatprep.subr.bf16.mxu0 %v10026_v0  ;;  %9218 = vmatprep.subr.bf16.mxu1 %v10026_v0 }
 0x421   :  { %9190 = vmatpush3.bf16.msra.mxu0 %v10299_v40  ;;  %9220 = vmatpush3.bf16.msra.mxu1 %v10141_v43 }
 0x422   :  { %9191 = vmatprep.subr.bf16.mxu0 %v10026_v0  ;;  %9221 = vmatprep.subr.bf16.mxu1 %v10026_v0 }
 0x425   :  { %9193 = vmatpush3.bf16.msra.mxu0 %v10305_v47  ;;  %9223 = vmatpush3.bf16.msra.mxu1 %v10143_v44 }
 0x426   :  { %9194 = vmatprep.subr.bf16.mxu0 %v10026_v0  ;;  %9248 = vmatprep.subr.bf16.mxu1 %v10026_v0 }
 0x428   :  { %7574 = vmatmul.mubr.f32.vlgmr.msra.gmra.mrb[26].mxu1 %v2058_v49 }
 0x429   :  { %9196 = vmatpush3.bf16.msra.mxu0 %v10311_v48  ;;  %9250 = vmatpush3.bf16.msra.mxu1 %v10078_v12 }
 0x42a   :  { %9197 = vmatprep.subr.bf16.mxu0 %v10026_v0  ;;  %9251 = vmatprep.subr.bf16.mxu1 %v10026_v0 }
 0x42b   :  { %7643 = vmatprep.mubr.msk.f32.mxu1 %vm10027_vm0, %v10028_v4 }
 0x42d   :  { %9199 = vmatpush3.bf16.msra.mxu0 %v10317_v50  ;;  %9253 = vmatpush3.bf16.msra.mxu1 %v10081_v13 }
 0x42e   :  { %9224 = vmatprep.subr.bf16.mxu0 %v10026_v0  ;;  %9254 = vmatprep.subr.bf16.mxu1 %v10026_v0 }
 0x430   :  { %7539 = vmatmul.mubr.f32.vlgmr.msra.gmra.mrb[14].mxu0 %v2057_v46 }
 0x431   :  { %9226 = vmatpush3.bf16.msra.mxu0 %v10198_v16  ;;  %9256 = vmatpush3.bf16.msra.mxu1 %v10093_v18 }
 0x432   :  { %9227 = vmatprep.subr.bf16.mxu0 %v10026_v0  ;;  %9257 = vmatprep.subr.bf16.mxu1 %v10026_v0 }
 0x433   :  { %7608 = vmatprep.mubr.msk.f32.mxu0 %vm10027_vm0, %v10028_v4 }
 0x435   :  { %9229 = vmatpush3.bf16.msra.mxu0 %v10200_v17  ;;  %9259 = vmatpush3.bf16.msra.mxu1 %v10123_v30 }
 0x436   :  { %9230 = vmatprep.subr.bf16.mxu0 %v10026_v0  ;;  %9260 = vmatprep.subr.bf16.mxu1 %v10026_v0 }
 0x439   :  { %9232 = vmatpush3.bf16.msra.mxu0 %v10202_v19  ;;  %9262 = vmatpush3.bf16.msra.mxu1 %v10135_v41 }
 0x43a   :  { %9233 = vmatprep.subr.bf16.mxu0 %v10026_v0  ;;  %9263 = vmatprep.subr.bf16.mxu1 %v10026_v0 }
 0x43d   :  { %9235 = vmatpush3.bf16.msra.mxu0 %v10205_v21  ;;  %9265 = vmatpush3.bf16.msra.mxu1 %v10139_v42 }
 0x43e   :  { %9236 = vmatprep.subr.bf16.mxu0 %v10026_v0  ;;  %9266 = vmatprep.subr.bf16.mxu1 %v10026_v0 }
 0x441   :  { %9238 = vmatpush3.bf16.msra.mxu0 %v10207_v22  ;;  %9268 = vmatpush3.bf16.msra.mxu1 %v10141_v43 }
 0x442   :  { %9239 = vmatprep.subr.bf16.mxu0 %v10026_v0  ;;  %9269 = vmatprep.subr.bf16.mxu1 %v10026_v0 }
 0x445   :  { %9241 = vmatpush3.bf16.msra.mxu0 %v10209_v23  ;;  %9271 = vmatpush3.bf16.msra.mxu1 %v10143_v44 }
 0x446   :  { %9242 = vmatprep.subr.bf16.mxu0 %v10026_v0  ;;  %9296 = vmatprep.subr.bf16.mxu1 %v10026_v0 }
 0x448   :  { %7644 = vmatmul.mubr.f32.vlgmr.msra.gmra.mrb[28].mxu1 %v10635_v45 }
 0x449   :  { %9244 = vmatpush3.bf16.msra.mxu0 %v10213_v27  ;;  %9298 = vmatpush3.bf16.msra.mxu1 %v10222_v31 }
 0x44a   :  { %9245 = vmatprep.subr.bf16.mxu0 %v10026_v0  ;;  %9299 = vmatprep.subr.bf16.mxu1 %v10026_v0 }
 0x44b   :  { %7713 = vmatprep.mubr.msk.f32.mxu1 %vm10027_vm0, %v10028_v4 }
 0x44d   :  { %9247 = vmatpush3.bf16.msra.mxu0 %v10217_v28  ;;  %9301 = vmatpush3.bf16.msra.mxu1 %v10232_v37 }
 0x44e   :  { %9272 = vmatprep.subr.bf16.mxu0 %v10026_v0  ;;  %9302 = vmatprep.subr.bf16.mxu1 %v10026_v0 }
 0x450   :  { %7609 = vmatmul.mubr.f32.vlgmr.msra.gmra.mrb[16].mxu0 %v10635_v45 }
 0x451   :  { %9274 = vmatpush3.bf16.msra.mxu0 %v10078_v12  ;;  %9304 = vmatpush3.bf16.msra.mxu1 %v10238_v60 }
 0x452   :  { %9275 = vmatprep.subr.bf16.mxu0 %v10026_v0  ;;  %9305 = vmatprep.subr.bf16.mxu1 %v10026_v0 }
 0x453   :  { %7678 = vmatprep.mubr.msk.f32.mxu0 %vm10027_vm0, %v10028_v4 }
 0x455   :  { %9277 = vmatpush3.bf16.msra.mxu0 %v10081_v13  ;;  %9307 = vmatpush3.bf16.msra.mxu1 %v10243_v1 }
 0x456   :  { %9278 = vmatprep.subr.bf16.mxu0 %v10026_v0  ;;  %9308 = vmatprep.subr.bf16.mxu1 %v10026_v0 }
 0x459   :  { %9280 = vmatpush3.bf16.msra.mxu0 %v10093_v18  ;;  %9310 = vmatpush3.bf16.msra.mxu1 %v10251_v7 }
 0x45a   :  { %9281 = vmatprep.subr.bf16.mxu0 %v10026_v0  ;;  %9311 = vmatprep.subr.bf16.mxu1 %v10026_v0 }
 0x45d   :  { %9283 = vmatpush3.bf16.msra.mxu0 %v10123_v30  ;;  %9313 = vmatpush3.bf16.msra.mxu1 %v10256_v9 }
 0x45e   :  { %9284 = vmatprep.subr.bf16.mxu0 %v10026_v0  ;;  %9314 = vmatprep.subr.bf16.mxu1 %v10026_v0 }
 0x461   :  { %9286 = vmatpush3.bf16.msra.mxu0 %v10135_v41  ;;  %9316 = vmatpush3.bf16.msra.mxu1 %v10262_v34 }
 0x462   :  { %9287 = vmatprep.subr.bf16.mxu0 %v10026_v0  ;;  %9317 = vmatprep.subr.bf16.mxu1 %v10026_v0 }
 0x465   :  { %9289 = vmatpush3.bf16.msra.mxu0 %v10139_v42  ;;  %9319 = vmatpush3.bf16.msra.mxu1 %v10266_v36 }
 0x466   :  { %9290 = vmatprep.subr.bf16.mxu0 %v10026_v0  ;;  %9344 = vmatprep.subr.bf16.mxu1 %v10026_v0 }
 0x469   :  { %9292 = vmatpush3.bf16.msra.mxu0 %v10141_v43 }
 0x46a   :  { %9293 = vmatprep.subr.bf16.mxu0 %v10026_v0 }
 0x46d   :  { %9295 = vmatpush3.bf16.msra.mxu0 %v10143_v44 }
 0x46e   :  { %9320 = vmatprep.subr.bf16.mxu0 %v10026_v0 }
 0x4db   :  { %v2213_v63 = vpop.f32.mrb[24].mxu1 }
 0x4dc   :  { %v7505_v2 = vpop.f32.mrb[25].mxu1 }
 0x4e3   :  { %v2062_v5 = vpop.f32.mrb[12].mxu0 }
 0x4e4   :  { %v2214_v6 = vadd.f32 %v2213_v63, %v2062_v5  ;;  %v7470_v24 = vpop.f32.mrb[13].mxu0 }
 0x4fb   :  { %v2406_v25 = vpop.f32.mrb[26].mxu1 }
 0x4fc   :  { %v7575_v8 = vpop.f32.mrb[27].mxu1 }
 0x503   :  { %v2317_v26 = vpop.f32.mrb[14].mxu0 }
 0x504   :  { %v2318_v29 = vadd.f32 %v2317_v26, %v2214_v6  ;;  %v7540_v32 = vpop.f32.mrb[15].mxu0 }
 0x506   :  { %v2407_v10 = vadd.f32 %v2406_v25, %v2318_v29 }
 0x51b   :  { %v2612_v33 = vpop.f32.mrb[28].mxu1 }
 0x51c   :  { %v7645_v11 = vpop.f32.mrb[29].mxu1 }
 0x523   :  { %v2525_v35 = vpop.f32.mrb[16].mxu0 }
 0x524   :  { %v2526_v14 = vadd.f32 %v2525_v35, %v2407_v10  ;;  %v7610_v51 = vpop.f32.mrb[17].mxu0 }
 0x526   :  { %v2613_v53 = vadd.f32 %v2612_v33, %v2526_v14  ;;  %v5883_v33 = vld [vmem:[%s11502_s0 + $0x20] sm:$0xff] }
 0x528   :  { %v2616_v54 = vadd.f32 %v5882_v52, %v2613_v53 }
 0x52a   :  { %10012 = vtanh.f32 %v2616_v54 }
 0x534   :  { %v10013_v55 = vpop.eup %10012 }
 0x535   :  { %v10752_v56 = vand.u32 4294901760, %v10013_v55 }
 0x537   :  { %7714 = vmatmul.mubr.f32.vlgmr.msra.gmra.mrb[30].mxu1 %v10752_v56  ;;  %v2702_v57 = vsub.f32 %v10013_v55, %v10752_v56 }
 0x538   :  { %9346 = vmatpush3.bf16.msra.mxu1 %v10078_v12  ;;  %7783 = vmatprep.mubr.msk.f32.mxu1 %vm10027_vm0, %v10028_v4 }
 0x539   :  { %9347 = vmatprep.subr.bf16.mxu1 %v10026_v0  ;;  %v2703_v58 = vand.u32 4294901760, %v2702_v57 }
 0x53b   :  { %v2704_v62 = vsub.f32 %v2702_v57, %v2703_v58 }
 0x53c   :  { %9349 = vmatpush3.bf16.msra.mxu1 %v10081_v13 }
 0x53d   :  { %9350 = vmatprep.subr.bf16.mxu1 %v10026_v0  ;;  %v2705_v3 = vand.u32 4294901760, %v2704_v62 }
 0x53f   :  { %7679 = vmatmul.mubr.f32.vlgmr.msra.gmra.mrb[18].mxu0 %v2705_v3 }
 0x540   :  { %9322 = vmatpush3.bf16.msra.mxu0 %v10272_v15  ;;  %9352 = vmatpush3.bf16.msra.mxu1 %v10093_v18 }
 0x541   :  { %9323 = vmatprep.subr.bf16.mxu0 %v10026_v0  ;;  %9353 = vmatprep.subr.bf16.mxu1 %v10026_v0 }
 0x542   :  { %7748 = vmatprep.mubr.msk.f32.mxu0 %vm10027_vm0, %v10028_v4 }
 0x544   :  { %9325 = vmatpush3.bf16.msra.mxu0 %v10279_v20  ;;  %9355 = vmatpush3.bf16.msra.mxu1 %v10123_v30 }
 0x545   :  { %9326 = vmatprep.subr.bf16.mxu0 %v10026_v0  ;;  %9356 = vmatprep.subr.bf16.mxu1 %v10026_v0 }
 0x548   :  { %9328 = vmatpush3.bf16.msra.mxu0 %v10287_v38  ;;  %9358 = vmatpush3.bf16.msra.mxu1 %v10135_v41 }
 0x549   :  { %9329 = vmatprep.subr.bf16.mxu0 %v10026_v0  ;;  %9359 = vmatprep.subr.bf16.mxu1 %v10026_v0 }
 0x54c   :  { %9331 = vmatpush3.bf16.msra.mxu0 %v10293_v39  ;;  %9361 = vmatpush3.bf16.msra.mxu1 %v10139_v42 }
 0x54d   :  { %9332 = vmatprep.subr.bf16.mxu0 %v10026_v0  ;;  %9362 = vmatprep.subr.bf16.mxu1 %v10026_v0 }
 0x550   :  { %9334 = vmatpush3.bf16.msra.mxu0 %v10299_v40  ;;  %9364 = vmatpush3.bf16.msra.mxu1 %v10141_v43 }
 0x551   :  { %9335 = vmatprep.subr.bf16.mxu0 %v10026_v0  ;;  %9365 = vmatprep.subr.bf16.mxu1 %v10026_v0 }
 0x554   :  { %9337 = vmatpush3.bf16.msra.mxu0 %v10305_v47  ;;  %9367 = vmatpush3.bf16.msra.mxu1 %v10143_v44 }
 0x555   :  { %9338 = vmatprep.subr.bf16.mxu0 %v10026_v0  ;;  %9392 = vmatprep.subr.bf16.mxu1 %v10026_v0 }
 0x557   :  { %7784 = vmatmul.mubr.f32.vlgmr.msra.gmra.mrb[32].mxu1 %v2703_v58 }
 0x558   :  { %9340 = vmatpush3.bf16.msra.mxu0 %v10311_v48  ;;  %9394 = vmatpush3.bf16.msra.mxu1 %v10078_v12 }
 0x559   :  { %9341 = vmatprep.subr.bf16.mxu0 %v10026_v0  ;;  %9395 = vmatprep.subr.bf16.mxu1 %v10026_v0 }
 0x55a   :  { %7853 = vmatprep.mubr.msk.f32.mxu1 %vm10027_vm0, %v10028_v4 }
 0x55c   :  { %9343 = vmatpush3.bf16.msra.mxu0 %v10317_v50  ;;  %9397 = vmatpush3.bf16.msra.mxu1 %v10081_v13 }
 0x55d   :  { %9368 = vmatprep.subr.bf16.mxu0 %v10026_v0  ;;  %9398 = vmatprep.subr.bf16.mxu1 %v10026_v0 }
 0x55f   :  { %7749 = vmatmul.mubr.f32.vlgmr.msra.gmra.mrb[20].mxu0 %v2702_v57 }
 0x560   :  { %9370 = vmatpush3.bf16.msra.mxu0 %v10198_v16  ;;  %9400 = vmatpush3.bf16.msra.mxu1 %v10093_v18 }
 0x561   :  { %9371 = vmatprep.subr.bf16.mxu0 %v10026_v0  ;;  %9401 = vmatprep.subr.bf16.mxu1 %v10026_v0 }
 0x562   :  { %7818 = vmatprep.mubr.msk.f32.mxu0 %vm10027_vm0, %v10028_v4 }
 0x564   :  { %9373 = vmatpush3.bf16.msra.mxu0 %v10200_v17  ;;  %9403 = vmatpush3.bf16.msra.mxu1 %v10123_v30 }
 0x565   :  { %9374 = vmatprep.subr.bf16.mxu0 %v10026_v0  ;;  %9404 = vmatprep.subr.bf16.mxu1 %v10026_v0 }
 0x568   :  { %9376 = vmatpush3.bf16.msra.mxu0 %v10202_v19  ;;  %9406 = vmatpush3.bf16.msra.mxu1 %v10135_v41 }
 0x569   :  { %9377 = vmatprep.subr.bf16.mxu0 %v10026_v0  ;;  %9407 = vmatprep.subr.bf16.mxu1 %v10026_v0 }
 0x56c   :  { %9379 = vmatpush3.bf16.msra.mxu0 %v10205_v21  ;;  %9409 = vmatpush3.bf16.msra.mxu1 %v10139_v42 }
 0x56d   :  { %9380 = vmatprep.subr.bf16.mxu0 %v10026_v0  ;;  %9410 = vmatprep.subr.bf16.mxu1 %v10026_v0 }
 0x570   :  { %9382 = vmatpush3.bf16.msra.mxu0 %v10207_v22  ;;  %9412 = vmatpush3.bf16.msra.mxu1 %v10141_v43 }
 0x571   :  { %9383 = vmatprep.subr.bf16.mxu0 %v10026_v0  ;;  %9413 = vmatprep.subr.bf16.mxu1 %v10026_v0 }
 0x574   :  { %9385 = vmatpush3.bf16.msra.mxu0 %v10209_v23  ;;  %9415 = vmatpush3.bf16.msra.mxu1 %v10143_v44 }
 0x575   :  { %9386 = vmatprep.subr.bf16.mxu0 %v10026_v0  ;;  %9440 = vmatprep.subr.bf16.mxu1 %v10026_v0 }
 0x577   :  { %7854 = vmatmul.mubr.f32.vlgmr.msra.gmra.mrb[34].mxu1 %v10752_v56 }
 0x578   :  { %9388 = vmatpush3.bf16.msra.mxu0 %v10213_v27  ;;  %9442 = vmatpush3.bf16.msra.mxu1 %v10222_v31 }
 0x579   :  { %9389 = vmatprep.subr.bf16.mxu0 %v10026_v0  ;;  %9443 = vmatprep.subr.bf16.mxu1 %v10026_v0 }
 0x57a   :  { %7923 = vmatprep.mubr.msk.f32.mxu1 %vm10027_vm0, %v10028_v4 }
 0x57c   :  { %9391 = vmatpush3.bf16.msra.mxu0 %v10217_v28  ;;  %9445 = vmatpush3.bf16.msra.mxu1 %v10232_v37 }
 0x57d   :  { %9416 = vmatprep.subr.bf16.mxu0 %v10026_v0  ;;  %9446 = vmatprep.subr.bf16.mxu1 %v10026_v0 }
 0x57f   :  { %7819 = vmatmul.mubr.f32.vlgmr.msra.gmra.mrb[22].mxu0 %v10752_v56 }
 0x580   :  { %9418 = vmatpush3.bf16.msra.mxu0 %v10078_v12  ;;  %9448 = vmatpush3.bf16.msra.mxu1 %v10238_v60 }
 0x581   :  { %9419 = vmatprep.subr.bf16.mxu0 %v10026_v0  ;;  %9449 = vmatprep.subr.bf16.mxu1 %v10026_v0 }
 0x582   :  { %7888 = vmatprep.mubr.msk.f32.mxu0 %vm10027_vm0, %v10028_v4 }
 0x584   :  { %9421 = vmatpush3.bf16.msra.mxu0 %v10081_v13  ;;  %9451 = vmatpush3.bf16.msra.mxu1 %v10243_v1 }
 0x585   :  { %9422 = vmatprep.subr.bf16.mxu0 %v10026_v0  ;;  %9452 = vmatprep.subr.bf16.mxu1 %v10026_v0 }
 0x588   :  { %9424 = vmatpush3.bf16.msra.mxu0 %v10093_v18  ;;  %9454 = vmatpush3.bf16.msra.mxu1 %v10251_v7 }
 0x589   :  { %9425 = vmatprep.subr.bf16.mxu0 %v10026_v0  ;;  %9455 = vmatprep.subr.bf16.mxu1 %v10026_v0 }
 0x58c   :  { %9427 = vmatpush3.bf16.msra.mxu0 %v10123_v30  ;;  %9457 = vmatpush3.bf16.msra.mxu1 %v10256_v9 }
 0x58d   :  { %9428 = vmatprep.subr.bf16.mxu0 %v10026_v0  ;;  %9458 = vmatprep.subr.bf16.mxu1 %v10026_v0 }
 0x590   :  { %9430 = vmatpush3.bf16.msra.mxu0 %v10135_v41  ;;  %9460 = vmatpush3.bf16.msra.mxu1 %v10262_v34 }
 0x591   :  { %9431 = vmatprep.subr.bf16.mxu0 %v10026_v0  ;;  %9461 = vmatprep.subr.bf16.mxu1 %v10026_v0 }
 0x594   :  { %9433 = vmatpush3.bf16.msra.mxu0 %v10139_v42  ;;  %9463 = vmatpush3.bf16.msra.mxu1 %v10266_v36 }
 0x595   :  { %9434 = vmatprep.subr.bf16.mxu0 %v10026_v0  ;;  %9488 = vmatprep.subr.bf16.mxu1 %v10026_v0 }
 0x598   :  { %9436 = vmatpush3.bf16.msra.mxu0 %v10141_v43 }
 0x599   :  { %9437 = vmatprep.subr.bf16.mxu0 %v10026_v0 }
 0x59c   :  { %9439 = vmatpush3.bf16.msra.mxu0 %v10143_v44 }
 0x59d   :  { %9464 = vmatprep.subr.bf16.mxu0 %v10026_v0 }
 0x60a   :  { %v2858_v45 = vpop.f32.mrb[30].mxu1 }
 0x60b   :  { %v7715_v46 = vpop.f32.mrb[31].mxu1 }
 0x612   :  { %v2707_v49 = vpop.f32.mrb[18].mxu0 }
 0x613   :  { %v2859_v59 = vadd.f32 %v2858_v45, %v2707_v49  ;;  %v7680_v61 = vpop.f32.mrb[19].mxu0 }
 0x62a   :  { %v3051_v63 = vpop.f32.mrb[32].mxu1 }
 0x62b   :  { %v7785_v2 = vpop.f32.mrb[33].mxu1 }
 0x632   :  { %v2962_v5 = vpop.f32.mrb[20].mxu0 }
 0x633   :  { %v2963_v6 = vadd.f32 %v2962_v5, %v2859_v59  ;;  %v7750_v24 = vpop.f32.mrb[21].mxu0 }
 0x635   :  { %v3052_v25 = vadd.f32 %v3051_v63, %v2963_v6 }
 0x64a   :  { %v3257_v8 = vpop.f32.mrb[34].mxu1 }
 0x64b   :  { %v7855_v26 = vpop.f32.mrb[35].mxu1 }
 0x652   :  { %v3170_v29 = vpop.f32.mrb[22].mxu0 }
 0x653   :  { %v3171_v32 = vadd.f32 %v3170_v29, %v3052_v25  ;;  %v7820_v10 = vpop.f32.mrb[23].mxu0 }
 0x655   :  { %v3258_v11 = vadd.f32 %v3257_v8, %v3171_v32  ;;  %v5884_v8 = vld [vmem:[%s11502_s0 + $0x28] sm:$0xff] }
 0x657   :  { %v3261_v35 = vadd.f32 %v5883_v33, %v3258_v11 }
 0x659   :  { %10014 = vtanh.f32 %v3261_v35 }
 0x663   :  { %v10015_v14 = vpop.eup %10014 }
 0x664   :  { %v10869_v51 = vand.u32 4294901760, %v10015_v14 }
 0x666   :  { %7924 = vmatmul.mubr.f32.vlgmr.msra.gmra.mrb[36].mxu1 %v10869_v51  ;;  %v3347_v52 = vsub.f32 %v10015_v14, %v10869_v51 }
 0x667   :  { %9490 = vmatpush3.bf16.msra.mxu1 %v10078_v12  ;;  %7993 = vmatprep.mubr.msk.f32.mxu1 %vm10027_vm0, %v10028_v4 }
 0x668   :  { %9491 = vmatprep.subr.bf16.mxu1 %v10026_v0  ;;  %v3348_v53 = vand.u32 4294901760, %v3347_v52 }
 0x66a   :  { %v3349_v54 = vsub.f32 %v3347_v52, %v3348_v53 }
 0x66b   :  { %9493 = vmatpush3.bf16.msra.mxu1 %v10081_v13 }
 0x66c   :  { %9494 = vmatprep.subr.bf16.mxu1 %v10026_v0  ;;  %v3350_v55 = vand.u32 4294901760, %v3349_v54 }
 0x66e   :  { %7889 = vmatmul.mubr.f32.vlgmr.msra.gmra.mrb[24].mxu0 %v3350_v55 }
 0x66f   :  { %9466 = vmatpush3.bf16.msra.mxu0 %v10272_v15  ;;  %9496 = vmatpush3.bf16.msra.mxu1 %v10093_v18 }
 0x670   :  { %9467 = vmatprep.subr.bf16.mxu0 %v10026_v0  ;;  %9497 = vmatprep.subr.bf16.mxu1 %v10026_v0 }
 0x671   :  { %7958 = vmatprep.mubr.msk.f32.mxu0 %vm10027_vm0, %v10028_v4 }
 0x673   :  { %9469 = vmatpush3.bf16.msra.mxu0 %v10279_v20  ;;  %9499 = vmatpush3.bf16.msra.mxu1 %v10123_v30 }
 0x674   :  { %9470 = vmatprep.subr.bf16.mxu0 %v10026_v0  ;;  %9500 = vmatprep.subr.bf16.mxu1 %v10026_v0 }
 0x677   :  { %9472 = vmatpush3.bf16.msra.mxu0 %v10287_v38  ;;  %9502 = vmatpush3.bf16.msra.mxu1 %v10135_v41 }
 0x678   :  { %9473 = vmatprep.subr.bf16.mxu0 %v10026_v0  ;;  %9503 = vmatprep.subr.bf16.mxu1 %v10026_v0 }
 0x67b   :  { %9475 = vmatpush3.bf16.msra.mxu0 %v10293_v39  ;;  %9505 = vmatpush3.bf16.msra.mxu1 %v10139_v42 }
 0x67c   :  { %9476 = vmatprep.subr.bf16.mxu0 %v10026_v0  ;;  %9506 = vmatprep.subr.bf16.mxu1 %v10026_v0 }
 0x67f   :  { %9478 = vmatpush3.bf16.msra.mxu0 %v10299_v40  ;;  %9508 = vmatpush3.bf16.msra.mxu1 %v10141_v43 }
 0x680   :  { %9479 = vmatprep.subr.bf16.mxu0 %v10026_v0  ;;  %9509 = vmatprep.subr.bf16.mxu1 %v10026_v0 }
 0x683   :  { %9481 = vmatpush3.bf16.msra.mxu0 %v10305_v47  ;;  %9511 = vmatpush3.bf16.msra.mxu1 %v10143_v44 }
 0x684   :  { %9482 = vmatprep.subr.bf16.mxu0 %v10026_v0  ;;  %9536 = vmatprep.subr.bf16.mxu1 %v10026_v0 }
 0x686   :  { %7994 = vmatmul.mubr.f32.vlgmr.msra.gmra.mrb[38].mxu1 %v3348_v53 }
 0x687   :  { %9484 = vmatpush3.bf16.msra.mxu0 %v10311_v48  ;;  %9538 = vmatpush3.bf16.msra.mxu1 %v10078_v12 }
 0x688   :  { %9485 = vmatprep.subr.bf16.mxu0 %v10026_v0  ;;  %9539 = vmatprep.subr.bf16.mxu1 %v10026_v0 }
 0x689   :  { %8063 = vmatprep.mubr.msk.f32.mxu1 %vm10027_vm0, %v10028_v4 }
 0x68b   :  { %9487 = vmatpush3.bf16.msra.mxu0 %v10317_v50  ;;  %9541 = vmatpush3.bf16.msra.mxu1 %v10081_v13 }
 0x68c   :  { %9512 = vmatprep.subr.bf16.mxu0 %v10026_v0  ;;  %9542 = vmatprep.subr.bf16.mxu1 %v10026_v0 }
 0x68e   :  { %7959 = vmatmul.mubr.f32.vlgmr.msra.gmra.mrb[26].mxu0 %v3347_v52 }
 0x68f   :  { %9514 = vmatpush3.bf16.msra.mxu0 %v10198_v16  ;;  %9544 = vmatpush3.bf16.msra.mxu1 %v10093_v18 }
 0x690   :  { %9515 = vmatprep.subr.bf16.mxu0 %v10026_v0  ;;  %9545 = vmatprep.subr.bf16.mxu1 %v10026_v0 }
 0x691   :  { %8028 = vmatprep.mubr.msk.f32.mxu0 %vm10027_vm0, %v10028_v4 }
 0x693   :  { %9517 = vmatpush3.bf16.msra.mxu0 %v10200_v17  ;;  %9547 = vmatpush3.bf16.msra.mxu1 %v10123_v30 }
 0x694   :  { %9518 = vmatprep.subr.bf16.mxu0 %v10026_v0  ;;  %9548 = vmatprep.subr.bf16.mxu1 %v10026_v0 }
 0x697   :  { %9520 = vmatpush3.bf16.msra.mxu0 %v10202_v19  ;;  %9550 = vmatpush3.bf16.msra.mxu1 %v10135_v41 }
 0x698   :  { %9521 = vmatprep.subr.bf16.mxu0 %v10026_v0  ;;  %9551 = vmatprep.subr.bf16.mxu1 %v10026_v0 }
 0x69b   :  { %9523 = vmatpush3.bf16.msra.mxu0 %v10205_v21  ;;  %9553 = vmatpush3.bf16.msra.mxu1 %v10139_v42 }
 0x69c   :  { %9524 = vmatprep.subr.bf16.mxu0 %v10026_v0  ;;  %9554 = vmatprep.subr.bf16.mxu1 %v10026_v0 }
 0x69f   :  { %9526 = vmatpush3.bf16.msra.mxu0 %v10207_v22  ;;  %9556 = vmatpush3.bf16.msra.mxu1 %v10141_v43 }
 0x6a0   :  { %9527 = vmatprep.subr.bf16.mxu0 %v10026_v0  ;;  %9557 = vmatprep.subr.bf16.mxu1 %v10026_v0 }
 0x6a3   :  { %9529 = vmatpush3.bf16.msra.mxu0 %v10209_v23  ;;  %9559 = vmatpush3.bf16.msra.mxu1 %v10143_v44 }
 0x6a4   :  { %9530 = vmatprep.subr.bf16.mxu0 %v10026_v0  ;;  %9584 = vmatprep.subr.bf16.mxu1 %v10026_v0 }
 0x6a6   :  { %8064 = vmatmul.mubr.f32.vlgmr.msra.gmra.mrb[40].mxu1 %v10869_v51 }
 0x6a7   :  { %9532 = vmatpush3.bf16.msra.mxu0 %v10213_v27  ;;  %9586 = vmatpush3.bf16.msra.mxu1 %v10222_v31 }
 0x6a8   :  { %9533 = vmatprep.subr.bf16.mxu0 %v10026_v0  ;;  %9587 = vmatprep.subr.bf16.mxu1 %v10026_v0 }
 0x6a9   :  { %8133 = vmatprep.mubr.msk.f32.mxu1 %vm10027_vm0, %v10028_v4 }
 0x6ab   :  { %9535 = vmatpush3.bf16.msra.mxu0 %v10217_v28  ;;  %9589 = vmatpush3.bf16.msra.mxu1 %v10232_v37 }
 0x6ac   :  { %9560 = vmatprep.subr.bf16.mxu0 %v10026_v0  ;;  %9590 = vmatprep.subr.bf16.mxu1 %v10026_v0 }
 0x6ae   :  { %8029 = vmatmul.mubr.f32.vlgmr.msra.gmra.mrb[28].mxu0 %v10869_v51 }
 0x6af   :  { %9562 = vmatpush3.bf16.msra.mxu0 %v10078_v12  ;;  %9592 = vmatpush3.bf16.msra.mxu1 %v10238_v60 }
 0x6b0   :  { %9563 = vmatprep.subr.bf16.mxu0 %v10026_v0  ;;  %9593 = vmatprep.subr.bf16.mxu1 %v10026_v0 }
 0x6b1   :  { %8098 = vmatprep.mubr.msk.f32.mxu0 %vm10027_vm0, %v10028_v4 }
 0x6b3   :  { %9565 = vmatpush3.bf16.msra.mxu0 %v10081_v13  ;;  %9595 = vmatpush3.bf16.msra.mxu1 %v10243_v1 }
 0x6b4   :  { %9566 = vmatprep.subr.bf16.mxu0 %v10026_v0  ;;  %9596 = vmatprep.subr.bf16.mxu1 %v10026_v0 }
 0x6b7   :  { %9568 = vmatpush3.bf16.msra.mxu0 %v10093_v18  ;;  %9598 = vmatpush3.bf16.msra.mxu1 %v10251_v7 }
 0x6b8   :  { %9569 = vmatprep.subr.bf16.mxu0 %v10026_v0  ;;  %9599 = vmatprep.subr.bf16.mxu1 %v10026_v0 }
 0x6bb   :  { %9571 = vmatpush3.bf16.msra.mxu0 %v10123_v30  ;;  %9601 = vmatpush3.bf16.msra.mxu1 %v10256_v9 }
 0x6bc   :  { %9572 = vmatprep.subr.bf16.mxu0 %v10026_v0  ;;  %9602 = vmatprep.subr.bf16.mxu1 %v10026_v0 }
 0x6bf   :  { %9574 = vmatpush3.bf16.msra.mxu0 %v10135_v41  ;;  %9604 = vmatpush3.bf16.msra.mxu1 %v10262_v34 }
 0x6c0   :  { %9575 = vmatprep.subr.bf16.mxu0 %v10026_v0  ;;  %9605 = vmatprep.subr.bf16.mxu1 %v10026_v0 }
 0x6c3   :  { %9577 = vmatpush3.bf16.msra.mxu0 %v10139_v42  ;;  %9607 = vmatpush3.bf16.msra.mxu1 %v10266_v36 }
 0x6c4   :  { %9578 = vmatprep.subr.bf16.mxu0 %v10026_v0  ;;  %9632 = vmatprep.subr.bf16.mxu1 %v10026_v0 }
 0x6c7   :  { %9580 = vmatpush3.bf16.msra.mxu0 %v10141_v43 }
 0x6c8   :  { %9581 = vmatprep.subr.bf16.mxu0 %v10026_v0 }
 0x6cb   :  { %9583 = vmatpush3.bf16.msra.mxu0 %v10143_v44 }
 0x6cc   :  { %9608 = vmatprep.subr.bf16.mxu0 %v10026_v0 }
 0x739   :  { %v3503_v56 = vpop.f32.mrb[36].mxu1 }
 0x73a   :  { %v7925_v57 = vpop.f32.mrb[37].mxu1 }
 0x741   :  { %v3352_v58 = vpop.f32.mrb[24].mxu0 }
 0x742   :  { %v3504_v62 = vadd.f32 %v3503_v56, %v3352_v58  ;;  %v7890_v3 = vpop.f32.mrb[25].mxu0 }
 0x759   :  { %v3696_v45 = vpop.f32.mrb[38].mxu1 }
 0x75a   :  { %v7995_v46 = vpop.f32.mrb[39].mxu1 }
 0x761   :  { %v3607_v49 = vpop.f32.mrb[26].mxu0 }
 0x762   :  { %v3608_v59 = vadd.f32 %v3607_v49, %v3504_v62  ;;  %v7960_v61 = vpop.f32.mrb[27].mxu0  ;;  %v5885_v62 = vld [vmem:[%s11502_s0 + $0x30] sm:$0xff] }
 0x764   :  { %v3697_v63 = vadd.f32 %v3696_v45, %v3608_v59 }
 0x779   :  { %v3902_v2 = vpop.f32.mrb[40].mxu1 }
 0x77a   :  { %v8065_v5 = vpop.f32.mrb[41].mxu1 }
 0x781   :  { %v3815_v6 = vpop.f32.mrb[28].mxu0 }
 0x782   :  { %v3816_v24 = vadd.f32 %v3815_v6, %v3697_v63  ;;  %v8030_v25 = vpop.f32.mrb[29].mxu0 }
 0x783   :  { %v5212_v25 = vld [vmem:[%s11503_s2 + $0x50] sm:$0xff] }
 0x784   :  { %v3903_v26 = vadd.f32 %v3902_v2, %v3816_v24 }
 0x786   :  { %v3906_v29 = vadd.f32 %v5884_v8, %v3903_v26  ;;  %v5213_v8 = vld [vmem:[%s11503_s2 + $0x58] sm:$0xff]  ;;  %v5256_v26 = vand.u32 4294901760, %v5212_v25 }
 0x788   :  { %10016 = vtanh.f32 %v3906_v29  ;;  %v5259_v29 = vand.u32 4294901760, %v5213_v8 }
 0x792   :  { %v10017_v32 = vpop.eup %10016 }
 0x793   :  { %v10986_v10 = vand.u32 4294901760, %v10017_v32 }
 0x795   :  { %8134 = vmatmul.mubr.f32.vlgmr.msra.gmra.mrb[42].mxu1 %v10986_v10  ;;  %v3992_v33 = vsub.f32 %v10017_v32, %v10986_v10  ;;  %v11242_v32 = vpack.c.bf16 %v5259_v29, %v5256_v26 }
 0x796   :  { %9634 = vmatpush3.bf16.msra.mxu1 %v10078_v12  ;;  %8203 = vmatprep.mubr.msk.f32.mxu1 %vm10027_vm0, %v10028_v4 }
 0x797   :  { %9635 = vmatprep.subr.bf16.mxu1 %v10026_v0  ;;  %v3993_v11 = vand.u32 4294901760, %v3992_v33 }
 0x799   :  { %v3994_v35 = vsub.f32 %v3992_v33, %v3993_v11 }
 0x79a   :  { %9637 = vmatpush3.bf16.msra.mxu1 %v10081_v13 }
 0x79b   :  { %9638 = vmatprep.subr.bf16.mxu1 %v10026_v0  ;;  %v3995_v14 = vand.u32 4294901760, %v3994_v35 }
 0x79d   :  { %8099 = vmatmul.mubr.f32.vlgmr.msra.gmra.mrb[30].mxu0 %v3995_v14 }
 0x79e   :  { %9610 = vmatpush3.bf16.msra.mxu0 %v10272_v15  ;;  %9640 = vmatpush3.bf16.msra.mxu1 %v10093_v18 }
 0x79f   :  { %9611 = vmatprep.subr.bf16.mxu0 %v10026_v0  ;;  %9641 = vmatprep.subr.bf16.mxu1 %v10026_v0 }
 0x7a0   :  { %8168 = vmatprep.mubr.msk.f32.mxu0 %vm10027_vm0, %v10028_v4 }
 0x7a2   :  { %9613 = vmatpush3.bf16.msra.mxu0 %v10279_v20  ;;  %9643 = vmatpush3.bf16.msra.mxu1 %v10123_v30 }
 0x7a3   :  { %9614 = vmatprep.subr.bf16.mxu0 %v10026_v0  ;;  %9644 = vmatprep.subr.bf16.mxu1 %v10026_v0 }
 0x7a6   :  { %9616 = vmatpush3.bf16.msra.mxu0 %v10287_v38  ;;  %9646 = vmatpush3.bf16.msra.mxu1 %v10135_v41 }
 0x7a7   :  { %9617 = vmatprep.subr.bf16.mxu0 %v10026_v0  ;;  %9647 = vmatprep.subr.bf16.mxu1 %v10026_v0 }
 0x7aa   :  { %9619 = vmatpush3.bf16.msra.mxu0 %v10293_v39  ;;  %9649 = vmatpush3.bf16.msra.mxu1 %v10139_v42 }
 0x7ab   :  { %9620 = vmatprep.subr.bf16.mxu0 %v10026_v0  ;;  %9650 = vmatprep.subr.bf16.mxu1 %v10026_v0 }
 0x7ae   :  { %9622 = vmatpush3.bf16.msra.mxu0 %v10299_v40  ;;  %9652 = vmatpush3.bf16.msra.mxu1 %v10141_v43 }
 0x7af   :  { %9623 = vmatprep.subr.bf16.mxu0 %v10026_v0  ;;  %9653 = vmatprep.subr.bf16.mxu1 %v10026_v0 }
 0x7b2   :  { %9625 = vmatpush3.bf16.msra.mxu0 %v10305_v47  ;;  %9655 = vmatpush3.bf16.msra.mxu1 %v10143_v44 }
 0x7b3   :  { %9626 = vmatprep.subr.bf16.mxu0 %v10026_v0  ;;  %9680 = vmatprep.subr.bf16.mxu1 %v10026_v0 }
 0x7b5   :  { %8204 = vmatmul.mubr.f32.vlgmr.msra.gmra.mrb[44].mxu1 %v3993_v11 }
 0x7b6   :  { %9628 = vmatpush3.bf16.msra.mxu0 %v10311_v48  ;;  %9682 = vmatpush3.bf16.msra.mxu1 %v10078_v12 }
 0x7b7   :  { %9629 = vmatprep.subr.bf16.mxu0 %v10026_v0  ;;  %9683 = vmatprep.subr.bf16.mxu1 %v10026_v0 }
 0x7b8   :  { %8273 = vmatprep.mubr.msk.f32.mxu1 %vm10027_vm0, %v10028_v4 }
 0x7ba   :  { %9631 = vmatpush3.bf16.msra.mxu0 %v10317_v50  ;;  %9685 = vmatpush3.bf16.msra.mxu1 %v10081_v13 }
 0x7bb   :  { %9656 = vmatprep.subr.bf16.mxu0 %v10026_v0  ;;  %9686 = vmatprep.subr.bf16.mxu1 %v10026_v0 }
 0x7bd   :  { %8169 = vmatmul.mubr.f32.vlgmr.msra.gmra.mrb[32].mxu0 %v3992_v33  ;;  %v5215_v33 = vld [vmem:[%s11503_s2 + $0x68] sm:$0xff] }
 0x7be   :  { %9658 = vmatpush3.bf16.msra.mxu0 %v10198_v16  ;;  %9688 = vmatpush3.bf16.msra.mxu1 %v10093_v18  ;;  %v5265_v35 = vand.u32 4294901760, %v5215_v33 }
 0x7bf   :  { %9659 = vmatprep.subr.bf16.mxu0 %v10026_v0  ;;  %9689 = vmatprep.subr.bf16.mxu1 %v10026_v0 }
 0x7c0   :  { %8238 = vmatprep.mubr.msk.f32.mxu0 %vm10027_vm0, %v10028_v4 }
 0x7c2   :  { %9661 = vmatpush3.bf16.msra.mxu0 %v10200_v17  ;;  %9691 = vmatpush3.bf16.msra.mxu1 %v10123_v30 }
 0x7c3   :  { %9662 = vmatprep.subr.bf16.mxu0 %v10026_v0  ;;  %9692 = vmatprep.subr.bf16.mxu1 %v10026_v0 }
 0x7c6   :  { %9664 = vmatpush3.bf16.msra.mxu0 %v10202_v19  ;;  %9694 = vmatpush3.bf16.msra.mxu1 %v10135_v41 }
 0x7c7   :  { %9665 = vmatprep.subr.bf16.mxu0 %v10026_v0  ;;  %9695 = vmatprep.subr.bf16.mxu1 %v10026_v0 }
 0x7ca   :  { %9667 = vmatpush3.bf16.msra.mxu0 %v10205_v21  ;;  %9697 = vmatpush3.bf16.msra.mxu1 %v10139_v42 }
 0x7cb   :  { %9668 = vmatprep.subr.bf16.mxu0 %v10026_v0  ;;  %9698 = vmatprep.subr.bf16.mxu1 %v10026_v0 }
 0x7ce   :  { %9670 = vmatpush3.bf16.msra.mxu0 %v10207_v22  ;;  %9700 = vmatpush3.bf16.msra.mxu1 %v10141_v43 }
 0x7cf   :  { %9671 = vmatprep.subr.bf16.mxu0 %v10026_v0  ;;  %9701 = vmatprep.subr.bf16.mxu1 %v10026_v0 }
 0x7d2   :  { %9673 = vmatpush3.bf16.msra.mxu0 %v10209_v23  ;;  %9703 = vmatpush3.bf16.msra.mxu1 %v10143_v44 }
 0x7d3   :  { %9674 = vmatprep.subr.bf16.mxu0 %v10026_v0  ;;  %9728 = vmatprep.subr.bf16.mxu1 %v10026_v0 }
 0x7d5   :  { %8274 = vmatmul.mubr.f32.vlgmr.msra.gmra.mrb[46].mxu1 %v10986_v10 }
 0x7d6   :  { %9676 = vmatpush3.bf16.msra.mxu0 %v10213_v27  ;;  %9730 = vmatpush3.bf16.msra.mxu1 %v10222_v31 }
 0x7d7   :  { %9677 = vmatprep.subr.bf16.mxu0 %v10026_v0  ;;  %9731 = vmatprep.subr.bf16.mxu1 %v10026_v0 }
 0x7d8   :  { %8343 = vmatprep.mubr.msk.f32.mxu1 %vm10027_vm0, %v10028_v4 }
 0x7da   :  { %9679 = vmatpush3.bf16.msra.mxu0 %v10217_v28  ;;  %9733 = vmatpush3.bf16.msra.mxu1 %v10232_v37 }
 0x7db   :  { %9704 = vmatprep.subr.bf16.mxu0 %v10026_v0  ;;  %9734 = vmatprep.subr.bf16.mxu1 %v10026_v0 }
 0x7dd   :  { %8239 = vmatmul.mubr.f32.vlgmr.msra.gmra.mrb[34].mxu0 %v10986_v10  ;;  %v5214_v10 = vld [vmem:[%s11503_s2 + $0x60] sm:$0xff] }
 0x7de   :  { %9706 = vmatpush3.bf16.msra.mxu0 %v10078_v12  ;;  %9736 = vmatpush3.bf16.msra.mxu1 %v10238_v60  ;;  %v5262_v11 = vand.u32 4294901760, %v5214_v10 }
 0x7df   :  { %9707 = vmatprep.subr.bf16.mxu0 %v10026_v0  ;;  %9737 = vmatprep.subr.bf16.mxu1 %v10026_v0 }
 0x7e0   :  { %8308 = vmatprep.mubr.msk.f32.mxu0 %vm10027_vm0, %v10028_v4 }
 0x7e2   :  { %9709 = vmatpush3.bf16.msra.mxu0 %v10081_v13  ;;  %9739 = vmatpush3.bf16.msra.mxu1 %v10243_v1 }
 0x7e3   :  { %9710 = vmatprep.subr.bf16.mxu0 %v10026_v0  ;;  %9740 = vmatprep.subr.bf16.mxu1 %v10026_v0 }
 0x7e6   :  { %9712 = vmatpush3.bf16.msra.mxu0 %v10093_v18  ;;  %9742 = vmatpush3.bf16.msra.mxu1 %v10251_v7 }
 0x7e7   :  { %9713 = vmatprep.subr.bf16.mxu0 %v10026_v0  ;;  %9743 = vmatprep.subr.bf16.mxu1 %v10026_v0 }
 0x7ea   :  { %9715 = vmatpush3.bf16.msra.mxu0 %v10123_v30  ;;  %9745 = vmatpush3.bf16.msra.mxu1 %v10256_v9 }
 0x7eb   :  { %9716 = vmatprep.subr.bf16.mxu0 %v10026_v0  ;;  %9746 = vmatprep.subr.bf16.mxu1 %v10026_v0 }
 0x7ee   :  { %9718 = vmatpush3.bf16.msra.mxu0 %v10135_v41  ;;  %9748 = vmatpush3.bf16.msra.mxu1 %v10262_v34 }
 0x7ef   :  { %9719 = vmatprep.subr.bf16.mxu0 %v10026_v0  ;;  %9749 = vmatprep.subr.bf16.mxu1 %v10026_v0 }
 0x7f2   :  { %9721 = vmatpush3.bf16.msra.mxu0 %v10139_v42  ;;  %9751 = vmatpush3.bf16.msra.mxu1 %v10266_v36 }
 0x7f3   :  { %9722 = vmatprep.subr.bf16.mxu0 %v10026_v0  ;;  %9776 = vmatprep.subr.bf16.mxu1 %v10026_v0 }
 0x7f6   :  { %9724 = vmatpush3.bf16.msra.mxu0 %v10141_v43 }
 0x7f7   :  { %9725 = vmatprep.subr.bf16.mxu0 %v10026_v0 }
 0x7fa   :  { %9727 = vmatpush3.bf16.msra.mxu0 %v10143_v44 }
 0x7fb   :  { %9752 = vmatprep.subr.bf16.mxu0 %v10026_v0 }
 0x868   :  { %v4148_v31 = vpop.f32.mrb[42].mxu1 }
 0x869   :  { %v8135_v37 = vpop.f32.mrb[43].mxu1 }
 0x870   :  { %v3997_v60 = vpop.f32.mrb[30].mxu0 }
 0x871   :  { %v4149_v1 = vadd.f32 %v4148_v31, %v3997_v60  ;;  %v8100_v7 = vpop.f32.mrb[31].mxu0 }
 0x872   :  { %v5217_v7 = vld [vmem:[%s11503_s2 + $0x78] sm:$0xff] }
 0x888   :  { %v4341_v9 = vpop.f32.mrb[44].mxu1 }
 0x889   :  { %v8205_v34 = vpop.f32.mrb[45].mxu1 }
 0x890   :  { %v4252_v36 = vpop.f32.mrb[32].mxu0 }
 0x891   :  { %v4253_v51 = vadd.f32 %v4252_v36, %v4149_v1  ;;  %v8170_v52 = vpop.f32.mrb[33].mxu0  ;;  %v5216_v1 = vld [vmem:[%s11503_s2 + $0x70] sm:$0xff] }
 0x892   :  { %v11274_v52 = vsub.f32 %v5212_v25, %v5256_v26 }
 0x893   :  { %v4342_v53 = vadd.f32 %v4341_v9, %v4253_v51 }
 0x8a8   :  { %v4547_v54 = vpop.f32.mrb[46].mxu1 }
 0x8a9   :  { %v8275_v55 = vpop.f32.mrb[47].mxu1 }
 0x8aa   :  { %v11280_v55 = vsub.f32 %v5214_v10, %v5262_v11 }
 0x8b0   :  { %v4460_v56 = vpop.f32.mrb[34].mxu0 }
 0x8b1   :  { %v4461_v57 = vadd.f32 %v4460_v56, %v4342_v53  ;;  %v8240_v58 = vpop.f32.mrb[35].mxu0  ;;  %v11276_v53 = vsub.f32 %v5213_v8, %v5259_v29  ;;  %v11282_v56 = vsub.f32 %v5215_v33, %v5265_v35 }
 0x8b2   :  { %v5271_v58 = vand.u32 4294901760, %v5217_v7 }
 0x8b3   :  { %v4548_v3 = vadd.f32 %v4547_v54, %v4461_v57  ;;  %v11278_v54 = vpack.c.bf16 %v5265_v35, %v5262_v11  ;;  %v5268_v57 = vand.u32 4294901760, %v5216_v1 }
 0x8b5   :  { %v4551_v45 = vadd.f32 %v5885_v62, %v4548_v3 }
 0x8b7   :  { %10018 = vtanh.f32 %v4551_v45  ;;  %v11288_v45 = vpack.c.bf16 %v5271_v58, %v5268_v57 }
 0x8c1   :  { %v10019_v46 = vpop.eup %10018 }
 0x8c2   :  { %v11103_v49 = vand.u32 4294901760, %v10019_v46 }
 0x8c4   :  { %8344 = vmatmul.mubr.f32.vlgmr.msra.gmra.mrb[48].mxu1 %v11103_v49  ;;  %v4637_v59 = vsub.f32 %v10019_v46, %v11103_v49  ;;  %v11290_v46 = vsub.f32 %v5216_v1, %v5268_v57  ;;  %v11511_v1 = vand.u32 4294901760, %v11274_v52 }
 0x8c5   :  { %9778 = vmatpush3.bf16.msra.mxu1 %v10078_v12  ;;  %8413 = vmatprep.mubr.msk.f32.mxu1 %vm10027_vm0, %v10028_v4 }
 0x8c6   :  { %9779 = vmatprep.subr.bf16.mxu1 %v10026_v0  ;;  %v4638_v61 = vand.u32 4294901760, %v4637_v59 }
 0x8c8   :  { %v4639_v63 = vsub.f32 %v4637_v59, %v4638_v61 }
 0x8c9   :  { %9781 = vmatpush3.bf16.msra.mxu1 %v10081_v13 }
 0x8ca   :  { %9782 = vmatprep.subr.bf16.mxu1 %v10026_v0  ;;  %v4640_v2 = vand.u32 4294901760, %v4639_v63 }
 0x8cc   :  { %8309 = vmatmul.mubr.f32.vlgmr.msra.gmra.mrb[36].mxu0 %v4640_v2 }
 0x8cd   :  { %9754 = vmatpush3.bf16.msra.mxu0 %v10272_v15  ;;  %9784 = vmatpush3.bf16.msra.mxu1 %v10093_v18 }
 0x8ce   :  { %9755 = vmatprep.subr.bf16.mxu0 %v10026_v0  ;;  %9785 = vmatprep.subr.bf16.mxu1 %v10026_v0 }
 0x8cf   :  { %8378 = vmatprep.mubr.msk.f32.mxu0 %vm10027_vm0, %v10028_v4 }
 0x8d1   :  { %9757 = vmatpush3.bf16.msra.mxu0 %v10279_v20  ;;  %9787 = vmatpush3.bf16.msra.mxu1 %v10123_v30  ;;  %v5208_v20 = vld [vmem:[%s11503_s2 + $0x30] sm:$0xff] }
 0x8d2   :  { %9758 = vmatprep.subr.bf16.mxu0 %v10026_v0  ;;  %9788 = vmatprep.subr.bf16.mxu1 %v10026_v0 }
 0x8d5   :  { %9760 = vmatpush3.bf16.msra.mxu0 %v10287_v38  ;;  %9790 = vmatpush3.bf16.msra.mxu1 %v10135_v41  ;;  %v5209_v38 = vld [vmem:[%s11503_s2 + $0x38] sm:$0xff] }
 0x8d6   :  { %9761 = vmatprep.subr.bf16.mxu0 %v10026_v0  ;;  %9791 = vmatprep.subr.bf16.mxu1 %v10026_v0 }
 0x8d9   :  { %9763 = vmatpush3.bf16.msra.mxu0 %v10293_v39  ;;  %9793 = vmatpush3.bf16.msra.mxu1 %v10139_v42  ;;  %v5244_v39 = vand.u32 4294901760, %v5208_v20 }
 0x8da   :  { %9764 = vmatprep.subr.bf16.mxu0 %v10026_v0  ;;  %9794 = vmatprep.subr.bf16.mxu1 %v10026_v0 }
 0x8db   :  { %v11266_v9 = vsub.f32 %v5208_v20, %v5244_v39 }
 0x8dd   :  { %9766 = vmatpush3.bf16.msra.mxu0 %v10299_v40  ;;  %9796 = vmatpush3.bf16.msra.mxu1 %v10141_v43  ;;  %v5247_v40 = vand.u32 4294901760, %v5209_v38 }
 0x8de   :  { %9767 = vmatprep.subr.bf16.mxu0 %v10026_v0  ;;  %9797 = vmatprep.subr.bf16.mxu1 %v10026_v0 }
 0x8df   :  { %v11268_v34 = vsub.f32 %v5209_v38, %v5247_v40 }
 0x8e1   :  { %9769 = vmatpush3.bf16.msra.mxu0 %v10305_v47  ;;  %9799 = vmatpush3.bf16.msra.mxu1 %v10143_v44  ;;  %v11222_v47 = vpack.c.bf16 %v5247_v40, %v5244_v39  ;;  %v11515_v39 = vand.u32 4294901760, %v11266_v9  ;;  %v11514_v40 = vand.u32 4294901760, %v11268_v34 }
 0x8e2   :  { %9770 = vmatprep.subr.bf16.mxu0 %v10026_v0  ;;  %9824 = vmatprep.subr.bf16.mxu1 %v10026_v0 }
 0x8e4   :  { %8414 = vmatmul.mubr.f32.vlgmr.msra.gmra.mrb[50].mxu1 %v4638_v61 }
 0x8e5   :  { %9772 = vmatpush3.bf16.msra.mxu0 %v10311_v48  ;;  %9826 = vmatpush3.bf16.msra.mxu1 %v10078_v12  ;;  %v5202_v12 = vld [vmem:[%s11503_s2] sm:$0xff] }
 0x8e6   :  { %9773 = vmatprep.subr.bf16.mxu0 %v10026_v0  ;;  %9827 = vmatprep.subr.bf16.mxu1 %v10026_v0  ;;  %v5210_v48 = vld [vmem:[%s11503_s2 + $0x40] sm:$0xff] }
 0x8e7   :  { %8483 = vmatprep.mubr.msk.f32.mxu1 %vm10027_vm0, %v10028_v4  ;;  %v5250_v5 = vand.u32 4294901760, %v5210_v48 }
 0x8e9   :  { %9775 = vmatpush3.bf16.msra.mxu0 %v10317_v50  ;;  %9829 = vmatpush3.bf16.msra.mxu1 %v10081_v13  ;;  %v5203_v13 = vld [vmem:[%s11503_s2 + $0x8] sm:$0xff]  ;;  %v11270_v36 = vsub.f32 %v5210_v48, %v5250_v5 }
 0x8ea   :  { %9800 = vmatprep.subr.bf16.mxu0 %v10026_v0  ;;  %9830 = vmatprep.subr.bf16.mxu1 %v10026_v0  ;;  %v5211_v50 = vld [vmem:[%s11503_s2 + $0x48] sm:$0xff] }
 0x8eb   :  { %v5253_v6 = vand.u32 4294901760, %v5211_v50  ;;  %v11513_v8 = vand.u32 4294901760, %v11270_v36 }
 0x8ec   :  { %8379 = vmatmul.mubr.f32.vlgmr.msra.gmra.mrb[38].mxu0 %v4637_v59 }
 0x8ed   :  { %9802 = vmatpush3.bf16.msra.mxu0 %v10198_v16  ;;  %9832 = vmatpush3.bf16.msra.mxu1 %v10093_v18  ;;  %v5226_v18 = vand.u32 4294901760, %v5202_v12  ;;  %v5205_v16 = vld [vmem:[%s11503_s2 + $0x18] sm:$0xff]  ;;  %v11232_v24 = vpack.c.bf16 %v5253_v6, %v5250_v5  ;;  %v11272_v51 = vsub.f32 %v5211_v50, %v5253_v6  ;;  %v5362_v50 = vsub.f32 %v11266_v9, %v11515_v39 }
 0x8ee   :  { %9803 = vmatprep.subr.bf16.mxu0 %v10026_v0  ;;  %9833 = vmatprep.subr.bf16.mxu1 %v10026_v0  ;;  %v5369_v5 = vsub.f32 %v11268_v34, %v11514_v40  ;;  %v5376_v10 = vsub.f32 %v11270_v36, %v11513_v8 }
 0x8ef   :  { %8448 = vmatprep.mubr.msk.f32.mxu0 %vm10027_vm0, %v10028_v4  ;;  %v5363_v6 = vand.u32 4294901760, %v5362_v50  ;;  %v11512_v26 = vand.u32 4294901760, %v11272_v51 }
 0x8f0   :  { %v5370_v25 = vand.u32 4294901760, %v5369_v5  ;;  %v5377_v11 = vand.u32 4294901760, %v5376_v10 }
 0x8f1   :  { %9805 = vmatpush3.bf16.msra.mxu0 %v10200_v17  ;;  %9835 = vmatpush3.bf16.msra.mxu1 %v10123_v30  ;;  %v5229_v30 = vand.u32 4294901760, %v5203_v13  ;;  %v5383_v33 = vsub.f32 %v11272_v51, %v11512_v26  ;;  %v5886_v26 = vld [vmem:[%s11502_s0 + $0x38] sm:$0xff] }
 0x8f2   :  { %9806 = vmatprep.subr.bf16.mxu0 %v10026_v0  ;;  %9836 = vmatprep.subr.bf16.mxu1 %v10026_v0  ;;  %v11334_v29 = vpack.c.bf16 %v5370_v25, %v5363_v6 }
 0x8f3   :  { %v5384_v35 = vand.u32 4294901760, %v5383_v33 }
 0x8f5   :  { %9808 = vmatpush3.bf16.msra.mxu0 %v10202_v19  ;;  %9838 = vmatpush3.bf16.msra.mxu1 %v10135_v41  ;;  %v11188_v41 = vpack.c.bf16 %v5229_v30, %v5226_v18  ;;  %v5235_v19 = vand.u32 4294901760, %v5205_v16  ;;  %v11344_v57 = vpack.c.bf16 %v5384_v35, %v5377_v11 }
 0x8f6   :  { %9809 = vmatprep.subr.bf16.mxu0 %v10026_v0  ;;  %9839 = vmatprep.subr.bf16.mxu1 %v10026_v0 }
 0x8f7   :  { %v11254_v31 = vsub.f32 %v5205_v16, %v5235_v19 }
 0x8f9   :  { %9811 = vmatpush3.bf16.msra.mxu0 %v10205_v21  ;;  %9841 = vmatpush3.bf16.msra.mxu1 %v10139_v42  ;;  %v11190_v42 = vsub.f32 %v5202_v12, %v5226_v18  ;;  %v5340_v12 = vand.u32 4294901760, %v11254_v31 }
 0x8fa   :  { %9812 = vmatprep.subr.bf16.mxu0 %v10026_v0  ;;  %9842 = vmatprep.subr.bf16.mxu1 %v10026_v0 }
 0x8fb   :  { %v5319_v62 = vand.u32 4294901760, %v11190_v42 }
 0x8fd   :  { %9814 = vmatpush3.bf16.msra.mxu0 %v10207_v22  ;;  %9844 = vmatpush3.bf16.msra.mxu1 %v10141_v43  ;;  %v11192_v43 = vsub.f32 %v5203_v13, %v5229_v30  ;;  %v5206_v22 = vld [vmem:[%s11503_s2 + $0x20] sm:$0xff]  ;;  %v5320_v59 = vsub.f32 %v11190_v42, %v5319_v62  ;;  %v5341_v30 = vsub.f32 %v11254_v31, %v5340_v12 }
 0x8fe   :  { %9815 = vmatprep.subr.bf16.mxu0 %v10026_v0  ;;  %9845 = vmatprep.subr.bf16.mxu1 %v10026_v0 }
 0x8ff   :  { %v5326_v3 = vand.u32 4294901760, %v11192_v43  ;;  %v5321_v63 = vand.u32 4294901760, %v5320_v59 }
 0x901   :  { %9817 = vmatpush3.bf16.msra.mxu0 %v10209_v23  ;;  %9847 = vmatpush3.bf16.msra.mxu1 %v10143_v44  ;;  %v5204_v44 = vld [vmem:[%s11503_s2 + $0x10] sm:$0xff]  ;;  %v5207_v23 = vld [vmem:[%s11503_s2 + $0x28] sm:$0xff]  ;;  %v5327_v61 = vsub.f32 %v11192_v43, %v5326_v3 }
 0x902   :  { %9818 = vmatprep.subr.bf16.mxu0 %v10026_v0  ;;  %v5232_v17 = vand.u32 4294901760, %v5204_v44 }
 0x903   :  { %v5328_v13 = vand.u32 4294901760, %v5327_v61 }
 0x904   :  { %8484 = vmatmul.mubr.f32.vlgmr.msra.gmra.mrb[52].mxu1 %v11103_v49  ;;  %v11202_v21 = vpack.c.bf16 %v5235_v19, %v5232_v17  ;;  %v11252_v14 = vsub.f32 %v5204_v44, %v5232_v17  ;;  %v5342_v17 = vand.u32 4294901760, %v5341_v30 }
 0x905   :  { %9820 = vmatpush3.bf16.msra.mxu0 %v10213_v27  ;;  %v5238_v27 = vand.u32 4294901760, %v5206_v22  ;;  %v11310_v44 = vpack.c.bf16 %v5328_v13, %v5321_v63  ;;  %v11509_v13 = vand.u32 4294901760, %v11280_v55 }
 0x906   :  { %9821 = vmatprep.subr.bf16.mxu0 %v10026_v0  ;;  %v5333_v2 = vand.u32 4294901760, %v11252_v14 }
 0x907   :  { %v11256_v37 = vsub.f32 %v5206_v22, %v5238_v27 }
 0x908   :  { %v5334_v18 = vsub.f32 %v11252_v14, %v5333_v2 }
 0x909   :  { %9823 = vmatpush3.bf16.msra.mxu0 %v10217_v28  ;;  %v5241_v28 = vand.u32 4294901760, %v5207_v23  ;;  %v5347_v19 = vand.u32 4294901760, %v11256_v37 }
 0x90a   :  { %9848 = vmatprep.subr.bf16.mxu0 %v10026_v0  ;;  %v5335_v16 = vand.u32 4294901760, %v5334_v18  ;;  %v11508_v18 = vand.u32 4294901760, %v11282_v56 }
 0x90b   :  { %v11212_v15 = vpack.c.bf16 %v5241_v28, %v5238_v27  ;;  %v11258_v60 = vsub.f32 %v5207_v23, %v5241_v28  ;;  %v5348_v27 = vsub.f32 %v11256_v37, %v5347_v19 }
 0x90c   :  { %8449 = vmatmul.mubr.f32.vlgmr.msra.gmra.mrb[40].mxu0 %v11103_v49  ;;  %v11292_v49 = vsub.f32 %v5217_v7, %v5271_v58  ;;  %v11314_v23 = vpack.c.bf16 %v5342_v17, %v5335_v16  ;;  %v11510_v7 = vand.u32 4294901760, %v11276_v53  ;;  %v5390_v58 = vsub.f32 %v11274_v52, %v11511_v1 }
 0x90d   :  { %8518 = vmatprep.mubr.msk.f32.mxu0 %vm10027_vm0, %v10028_v4  ;;  %9850 = vmatpush3.bf16.msra.mxu0 %v11188_v41  ;;  %v11516_v22 = vand.u32 4294901760, %v11258_v60  ;;  %v5349_v20 = vand.u32 4294901760, %v5348_v27  ;;  %v5404_v16 = vsub.f32 %v11280_v55, %v11509_v13  ;;  %v5411_v17 = vsub.f32 %v11282_v56, %v11508_v18 }
 0x90e   :  { %9851 = vmatprep.subr.bf16.mxu0 %v10026_v0  ;;  %v5397_v59 = vsub.f32 %v11276_v53, %v11510_v7  ;;  %v5391_v61 = vand.u32 4294901760, %v5390_v58  ;;  %v9897_v58 = vpack.c.bf16 %v11192_v43, %v11190_v42  ;;  %v11517_v42 = vand.u32 4294901760, %v11258_v60 }
 0x90f   :  { %v5355_v28 = vsub.f32 %v11258_v60, %v11516_v22  ;;  %v5405_v27 = vand.u32 4294901760, %v5404_v16 }
 0x910   :  { %v5398_v63 = vand.u32 4294901760, %v5397_v59  ;;  %v9900_v59 = vpack.c.bf16 %v11254_v31, %v11252_v14  ;;  %v9951_v43 = vpack.c.bf16 %v11517_v42, %v5347_v19  ;;  %v11519_v14 = vand.u32 4294901760, %v11268_v34 }
 0x911   :  { %9853 = vmatpush3.bf16.msra.mxu0 %v11202_v21  ;;  %v5356_v38 = vand.u32 4294901760, %v5355_v28  ;;  %v5412_v28 = vand.u32 4294901760, %v5411_v17  ;;  %v9903_v17 = vpack.c.bf16 %v11258_v60, %v11256_v37  ;;  %v11522_v37 = vand.u32 4294901760, %v11274_v52 }
 0x912   :  { %9854 = vmatprep.subr.bf16.mxu0 %v10026_v0  ;;  %v9888_v30 = vpack.c.bf16 %v5398_v63, %v5391_v61  ;;  %v11523_v60 = vand.u32 4294901760, %v11276_v53 }
 0x913   :  { %v11324_v48 = vpack.c.bf16 %v5356_v38, %v5349_v20  ;;  %v11507_v20 = vand.u32 4294901760, %v11290_v46  ;;  %v11506_v38 = vand.u32 4294901760, %v11292_v49  ;;  %v9891_v50 = vpack.c.bf16 %v5412_v28, %v5405_v27 }
 0x914   :  { %v9906_v27 = vpack.c.bf16 %v11268_v34, %v11266_v9  ;;  %v9909_v28 = vpack.c.bf16 %v11272_v51, %v11270_v36  ;;  %v9960_v19 = vpack.c.bf16 %v11523_v60, %v11522_v37  ;;  %v11525_v34 = vand.u32 4294901760, %v11282_v56 }
 0x915   :  { %9856 = vmatpush3.bf16.msra.mxu0 %v11212_v15  ;;  %v5418_v5 = vsub.f32 %v11290_v46, %v11507_v20  ;;  %v5425_v6 = vsub.f32 %v11292_v49, %v11506_v38 }
 0x916   :  { %9857 = vmatprep.subr.bf16.mxu0 %v10026_v0 }
 0x917   :  { %v5419_v25 = vand.u32 4294901760, %v5418_v5  ;;  %v5426_v10 = vand.u32 4294901760, %v5425_v6  ;;  %v9912_v5 = vpack.c.bf16 %v11276_v53, %v11274_v52  ;;  %v9915_v6 = vpack.c.bf16 %v11282_v56, %v11280_v55 }
 0x919   :  { %9859 = vmatpush3.bf16.msra.mxu0 %v11222_v47  ;;  %v9894_v33 = vpack.c.bf16 %v5426_v10, %v5419_v25  ;;  %v9918_v25 = vpack.c.bf16 %v11292_v49, %v11290_v46 }
 0x91a   :  { %9860 = vmatprep.subr.bf16.mxu0 %v10026_v0 }
 0x91d   :  { %9862 = vmatpush3.bf16.msra.mxu0 %v11232_v24 }
 0x91e   :  { %9863 = vmatprep.subr.bf16.mxu0 %v10026_v0 }
 0x921   :  { %9865 = vmatpush3.bf16.msra.mxu0 %v11242_v32 }
 0x922   :  { %9866 = vmatprep.subr.bf16.mxu0 %v10026_v0 }
 0x925   :  { %9868 = vmatpush3.bf16.msra.mxu0 %v11278_v54 }
 0x926   :  { %9869 = vmatprep.subr.bf16.mxu0 %v10026_v0 }
 0x929   :  { %9871 = vmatpush3.bf16.msra.mxu0 %v11288_v45 }
 0x92a   :  { %9872 = vmatprep.subr.bf16.mxu0 %v10026_v0 }
 0x997   :  { %v4793_v11 = vpop.f32.mrb[48].mxu1 }
 0x998   :  { %v8345_v35 = vpop.f32.mrb[49].mxu1 }
 0x99f   :  { %v4642_v61 = vpop.f32.mrb[36].mxu0 }
 0x9a0   :  { %v4794_v63 = vadd.f32 %v4793_v11, %v4642_v61  ;;  %v8310_v16 = vpop.f32.mrb[37].mxu0 }
 0x9b7   :  { %v4986_v10 = vpop.f32.mrb[50].mxu1 }
 0x9b8   :  { %v8415_v11 = vpop.f32.mrb[51].mxu1 }
 0x9bf   :  { %v4897_v35 = vpop.f32.mrb[38].mxu0 }
 0x9c0   :  { %v4898_v61 = vadd.f32 %v4897_v35, %v4794_v63  ;;  %v8380_v16 = vpop.f32.mrb[39].mxu0 }
 0x9c2   :  { %v4987_v38 = vadd.f32 %v4986_v10, %v4898_v61 }
 0x9d7   :  { %v5192_v20 = vpop.f32.mrb[52].mxu1 }
 0x9d8   :  { %v8485_v18 = vpop.f32.mrb[53].mxu1 }
 0x9df   :  { %v5105_v13 = vpop.f32.mrb[40].mxu0 }
 0x9e0   :  { %v5106_v7 = vadd.f32 %v5105_v13, %v4987_v38  ;;  %v8450_v1 = vpop.f32.mrb[41].mxu0 }
 0x9e2   :  { %v5193_v8 = vadd.f32 %v5192_v20, %v5106_v7 }
 0x9e4   :  { %v5196_v40 = vadd.f32 %v5886_v26, %v5193_v8 }
 0x9e6   :  { %10020 = vtanh.f32 %v5196_v40 }
 0x9f0   :  { %v10021_v39 = vpop.eup %10020 }
 0x9f1   :  { %v11387_v22 = vand.u32 4294901760, %v10021_v39 }
 0x9f3   :  { %v5307_v11 = vsub.f32 %v10021_v39, %v11387_v22 }
 0x9f5   :  { %v5308_v63 = vand.u32 4294901760, %v5307_v11 }
 0x9f7   :  { %v5309_v35 = vsub.f32 %v5307_v11, %v5308_v63 }
 0x9f9   :  { %v5310_v10 = vand.u32 4294901760, %v5309_v35 }
 0x9fb   :  { %8519 = vmatmul.mubr.f32.vlgmr.msra.gmra.mrb[42].mxu0 %v5310_v10 }
 0x9fc   :  { %9874 = vmatpush3.bf16.msra.mxu0 %v11310_v44  ;;  %8553 = vmatprep.mubr.msk.f32.mxu0 %vm10027_vm0, %v10028_v4  ;;  %v9945_v44 = vpack.c.bf16 %v5326_v3, %v5319_v62  ;;  %v11518_v62 = vand.u32 4294901760, %v11266_v9  ;;  %v11520_v3 = vand.u32 4294901760, %v11270_v36  ;;  %v11524_v9 = vand.u32 4294901760, %v11280_v55 }
 0x9fd   :  { %9875 = vmatprep.subr.bf16.mxu0 %v10026_v0  ;;  %v11526_v36 = vand.u32 4294901760, %v11290_v46 }
 0x9fe   :  { %v9954_v31 = vpack.c.bf16 %v11519_v14, %v11518_v62  ;;  %v9963_v39 = vpack.c.bf16 %v11525_v34, %v11524_v9 }
 0xa00   :  { %9877 = vmatpush3.bf16.msra.mxu0 %v11314_v23  ;;  %v9948_v23 = vpack.c.bf16 %v5340_v12, %v5333_v2  ;;  %v11521_v2 = vand.u32 4294901760, %v11272_v51  ;;  %v11527_v51 = vand.u32 4294901760, %v11292_v49 }
 0xa01   :  { %9878 = vmatprep.subr.bf16.mxu0 %v10026_v0 }
 0xa02   :  { %v9957_v12 = vpack.c.bf16 %v11521_v2, %v11520_v3  ;;  %v9966_v40 = vpack.c.bf16 %v11527_v51, %v11526_v36 }
 0xa04   :  { %9880 = vmatpush3.bf16.msra.mxu0 %v11324_v48 }
 0xa05   :  { %9881 = vmatprep.subr.bf16.mxu0 %v10026_v0 }
 0xa08   :  { %9883 = vmatpush3.bf16.msra.mxu0 %v11334_v29 }
 0xa09   :  { %9884 = vmatprep.subr.bf16.mxu0 %v10026_v0 }
 0xa0c   :  { %9886 = vmatpush3.bf16.msra.mxu0 %v11344_v57 }
 0xa0d   :  { %9887 = vmatprep.subr.bf16.mxu0 %v10026_v0 }
 0xa10   :  { %9889 = vmatpush3.bf16.msra.mxu0 %v9888_v30 }
 0xa11   :  { %9890 = vmatprep.subr.bf16.mxu0 %v10026_v0 }
 0xa14   :  { %9892 = vmatpush3.bf16.msra.mxu0 %v9891_v50 }
 0xa15   :  { %9893 = vmatprep.subr.bf16.mxu0 %v10026_v0 }
 0xa18   :  { %9895 = vmatpush3.bf16.msra.mxu0 %v9894_v33 }
 0xa19   :  { %9896 = vmatprep.subr.bf16.mxu0 %v10026_v0 }
 0xa1b   :  { %8554 = vmatmul.mubr.f32.vlgmr.msra.gmra.mrb[42].mxu0 %v11387_v22 }
 0xa1c   :  { %9898 = vmatpush3.bf16.msra.mxu0 %v9897_v58  ;;  %8588 = vmatprep.mubr.msk.f32.mxu0 %vm10027_vm0, %v10028_v4 }
 0xa1d   :  { %9899 = vmatprep.subr.bf16.mxu0 %v10026_v0 }
 0xa20   :  { %9901 = vmatpush3.bf16.msra.mxu0 %v9900_v59 }
 0xa21   :  { %9902 = vmatprep.subr.bf16.mxu0 %v10026_v0 }
 0xa24   :  { %9904 = vmatpush3.bf16.msra.mxu0 %v9903_v17 }
 0xa25   :  { %9905 = vmatprep.subr.bf16.mxu0 %v10026_v0 }
 0xa28   :  { %9907 = vmatpush3.bf16.msra.mxu0 %v9906_v27 }
 0xa29   :  { %9908 = vmatprep.subr.bf16.mxu0 %v10026_v0 }
 0xa2c   :  { %9910 = vmatpush3.bf16.msra.mxu0 %v9909_v28 }
 0xa2d   :  { %9911 = vmatprep.subr.bf16.mxu0 %v10026_v0 }
 0xa30   :  { %9913 = vmatpush3.bf16.msra.mxu0 %v9912_v5 }
 0xa31   :  { %9914 = vmatprep.subr.bf16.mxu0 %v10026_v0 }
 0xa34   :  { %9916 = vmatpush3.bf16.msra.mxu0 %v9915_v6 }
 0xa35   :  { %9917 = vmatprep.subr.bf16.mxu0 %v10026_v0 }
 0xa38   :  { %9919 = vmatpush3.bf16.msra.mxu0 %v9918_v25 }
 0xa39   :  { %9920 = vmatprep.subr.bf16.mxu0 %v10026_v0 }
 0xa3b   :  { %8589 = vmatmul.mubr.f32.vlgmr.msra.gmra.mrb[42].mxu0 %v5307_v11 }
 0xa3c   :  { %9922 = vmatpush3.bf16.msra.mxu0 %v11188_v41  ;;  %8623 = vmatprep.mubr.msk.f32.mxu0 %vm10027_vm0, %v10028_v4 }
 0xa3d   :  { %9923 = vmatprep.subr.bf16.mxu0 %v10026_v0 }
 0xa40   :  { %9925 = vmatpush3.bf16.msra.mxu0 %v11202_v21 }
 0xa41   :  { %9926 = vmatprep.subr.bf16.mxu0 %v10026_v0 }
 0xa44   :  { %9928 = vmatpush3.bf16.msra.mxu0 %v11212_v15 }
 0xa45   :  { %9929 = vmatprep.subr.bf16.mxu0 %v10026_v0 }
 0xa48   :  { %9931 = vmatpush3.bf16.msra.mxu0 %v11222_v47 }
 0xa49   :  { %9932 = vmatprep.subr.bf16.mxu0 %v10026_v0 }
 0xa4c   :  { %9934 = vmatpush3.bf16.msra.mxu0 %v11232_v24 }
 0xa4d   :  { %9935 = vmatprep.subr.bf16.mxu0 %v10026_v0 }
 0xa50   :  { %9937 = vmatpush3.bf16.msra.mxu0 %v11242_v32 }
 0xa51   :  { %9938 = vmatprep.subr.bf16.mxu0 %v10026_v0 }
 0xa54   :  { %9940 = vmatpush3.bf16.msra.mxu0 %v11278_v54 }
 0xa55   :  { %9941 = vmatprep.subr.bf16.mxu0 %v10026_v0 }
 0xa58   :  { %9943 = vmatpush3.bf16.msra.mxu0 %v11288_v45 }
 0xa59   :  { %9944 = vmatprep.subr.bf16.mxu0 %v10026_v0 }
 0xa5b   :  { %8624 = vmatmul.mubr.f32.vlgmr.msra.gmra.mrb[42].mxu0 %v5308_v63 }
 0xa5c   :  { %9946 = vmatpush3.bf16.msra.mxu0 %v9945_v44  ;;  %8658 = vmatprep.mubr.msk.f32.mxu0 %vm10027_vm0, %v10028_v4 }
 0xa5d   :  { %9947 = vmatprep.subr.bf16.mxu0 %v10026_v0 }
 0xa60   :  { %9949 = vmatpush3.bf16.msra.mxu0 %v9948_v23 }
 0xa61   :  { %9950 = vmatprep.subr.bf16.mxu0 %v10026_v0 }
 0xa64   :  { %9952 = vmatpush3.bf16.msra.mxu0 %v9951_v43 }
 0xa65   :  { %9953 = vmatprep.subr.bf16.mxu0 %v10026_v0 }
 0xa68   :  { %9955 = vmatpush3.bf16.msra.mxu0 %v9954_v31 }
 0xa69   :  { %9956 = vmatprep.subr.bf16.mxu0 %v10026_v0 }
 0xa6c   :  { %9958 = vmatpush3.bf16.msra.mxu0 %v9957_v12 }
 0xa6d   :  { %9959 = vmatprep.subr.bf16.mxu0 %v10026_v0 }
 0xa70   :  { %9961 = vmatpush3.bf16.msra.mxu0 %v9960_v19 }
 0xa71   :  { %9962 = vmatprep.subr.bf16.mxu0 %v10026_v0 }
 0xa74   :  { %9964 = vmatpush3.bf16.msra.mxu0 %v9963_v39 }
 0xa75   :  { %9965 = vmatprep.subr.bf16.mxu0 %v10026_v0 }
 0xa78   :  { %9967 = vmatpush3.bf16.msra.mxu0 %v9966_v40 }
 0xa79   :  { %9968 = vmatprep.subr.bf16.mxu0 %v10026_v0 }
 0xa7b   :  { %8659 = vmatmul.mubr.f32.vlgmr.msra.gmra.mrb[42].mxu0 %v11387_v22 }
 0xa7c   :  { %9970 = vmatpush3.bf16.msra.mxu0 %v11188_v41  ;;  %8693 = vmatprep.mubr.msk.f32.mxu0 %vm10027_vm0, %v10028_v4  ;;  %v5887_v4 = vld [vmem:[%s11504_s3] ss:$0 sm:$0xff] }
 0xa7d   :  { %9971 = vmatprep.subr.bf16.mxu0 %v10026_v0 }
 0xa80   :  { %9973 = vmatpush3.bf16.msra.mxu0 %v11202_v21 }
 0xa81   :  { %9974 = vmatprep.subr.bf16.mxu0 %v10026_v0 }
 0xa84   :  { %9976 = vmatpush3.bf16.msra.mxu0 %v11212_v15 }
 0xa85   :  { %9977 = vmatprep.subr.bf16.mxu0 %v10026_v0 }
 0xa88   :  { %9979 = vmatpush3.bf16.msra.mxu0 %v11222_v47 }
 0xa89   :  { %9980 = vmatprep.subr.bf16.mxu0 %v10026_v0 }
 0xa8c   :  { %9982 = vmatpush3.bf16.msra.mxu0 %v11232_v24 }
 0xa8d   :  { %9983 = vmatprep.subr.bf16.mxu0 %v10026_v0 }
 0xa90   :  { %9985 = vmatpush3.bf16.msra.mxu0 %v11242_v32 }
 0xa91   :  { %9986 = vmatprep.subr.bf16.mxu0 %v10026_v0 }
 0xa94   :  { %9988 = vmatpush3.bf16.msra.mxu0 %v11278_v54 }
 0xa95   :  { %9989 = vmatprep.subr.bf16.mxu0 %v10026_v0 }
 0xa98   :  { %9991 = vmatpush3.bf16.msra.mxu0 %v11288_v45 }
 0xa9b   :  { %8694 = vmatmul.mubr.f32.vlgmr.msra.gmra.mrb[42].mxu0 %v11387_v22 }
 0xb6e   :  { %v5862_v41 = vpop.f32.mrb[42].mxu0 }
 0xb6f   :  { %v9992_v21 = vadd.f32 %v5887_v4, %v5862_v41  ;;  %v8695_v15 = vpop.f32.mrb[43].mxu0 }
 0xb71   :  { %5866 = vmax.xlane.f32.xlu0 %v9992_v21 }
 0xbfe   :  { %v5867_v47 = vpop.xlane.xlu0 %5866 }
 0xbff   :  { %v5868_v24 = vsub.f32 %v9992_v21, %v5867_v47 }
 0xc01   :  { %v5869_v32 = vmul.f32 1.442695, %v5868_v24 }
 0xc03   :  { %10022 = vpow2.f32 %v5869_v32 }
 0xc0d   :  { %v10023_v52 = vpop.eup %10022 }
 0xc0e   :  { %5871 = vadd.xlane.f32.xlu0 %v10023_v52 }
 0xc9b   :  { %v5872_v53 = vpop.xlane.xlu0 %5871 }
 0xc9c   :  { %10024 = vrcp.f32 %v5872_v53 }
 0xca6   :  { %v10025_v0 = vpop.eup %10024 }
 0xca7   :  { %v5874_v54 = vmul.f32 %v10025_v0, %v10023_v52 }
 0xca9   :  { %5875 = vst [vmem:[%s11505_s4] sm:$0xff] %v5874_v54 }

</bundles_post_ra>
